<compile_context>
chip_gen: v7x
topology: tpu7x:2x2x1
jax: 0.10.0
libtpu: 0.0.40
codegen_flags: <defaults>
</compile_context>

<pallas_src>
import functools
import math

import jax
import jax.numpy as jnp
from jax.experimental import pallas as pl
from jax.experimental.pallas import tpu as pltpu


EPS = 1e-5
NEG_SLOPE = 0.2
HIDDEN = 1024           # width of the last hidden layer
VMEM_LIMIT = 32 * 1024 * 1024


def _round_up(x, m):
    return (x + m - 1) // m * m


def _pick_tile_n(out_pad):
    """Largest lane-dense output tile that evenly divides out_pad."""
    for cand in (512, 256, 128):
        if out_pad % cand == 0:
            return cand
    return 128  # unreachable: out_pad is always a multiple of 128


def _leaky_relu(x):
    return jnp.where(x > 0, x, NEG_SLOPE * x)


def _bn_leaky(h, gamma, beta, inv_b):
    """Train-mode BatchNorm1d (biased variance, centered two-pass) folded into
    a single per-feature affine and fused with LeakyReLU(0.2).
    h: (B, N) f32; gamma/beta: (1, N) f32."""
    mean = jnp.sum(h, axis=0, keepdims=True) * inv_b      # cross-sublane reduce
    c = h - mean
    var = jnp.sum(c * c, axis=0, keepdims=True) * inv_b   # centered (robust)
    scale = gamma * jax.lax.rsqrt(var + EPS)               # (1, N)
    y = c * scale + beta                                   # 2 VPU ops / element
    return jnp.where(y > 0, y, NEG_SLOPE * y)


# ----------------------------------------------------------------------------
# Kernel 1: trunk = blocks 1..4 (all weights VMEM-resident, ~1.4 MB bf16).
# ----------------------------------------------------------------------------
def trunk_kernel(
    x_ref,                       # (B, in_pad)   bf16
    w1_ref, b1_ref,              # (in_pad, 128) bf16, (1, 128)  f32
    w2_ref, g2_ref, be2_ref,     # (128, 256)    bf16, (1, 256)  f32 x2
    w3_ref, g3_ref, be3_ref,     # (256, 512)    bf16, (1, 512)  f32 x2
    w4_ref, g4_ref, be4_ref,     # (512, 1024)   bf16, (1, 1024) f32 x2
    h4_ref,                      # (B, 1024)     bf16
):
    inv_b = jnp.float32(1.0 / x_ref.shape[0])              # static batch size

    # Block 1: Linear + bias -> LeakyReLU (no BatchNorm).
    h = jnp.dot(x_ref[...], w1_ref[...], preferred_element_type=jnp.float32)
    h = _leaky_relu(h + b1_ref[...])

    # Block 2: Linear (bias cancelled by BN) -> BN -> LeakyReLU.
    h = jnp.dot(h.astype(jnp.bfloat16), w2_ref[...],
                preferred_element_type=jnp.float32)
    h = _bn_leaky(h, g2_ref[...], be2_ref[...], inv_b)

    # Block 3.
    h = jnp.dot(h.astype(jnp.bfloat16), w3_ref[...],
                preferred_element_type=jnp.float32)
    h = _bn_leaky(h, g3_ref[...], be3_ref[...], inv_b)

    # Block 4.
    h = jnp.dot(h.astype(jnp.bfloat16), w4_ref[...],
                preferred_element_type=jnp.float32)
    h = _bn_leaky(h, g4_ref[...], be4_ref[...], inv_b)

    h4_ref[...] = h.astype(h4_ref.dtype)


# ----------------------------------------------------------------------------
# Kernel 2: head = Linear(1024, out_dim) + tanh, tiled over output columns.
# W5 is streamed one (1024, TN) tile per grid step (double-buffered DMA).
# ----------------------------------------------------------------------------
def head_kernel(h4_ref, w5_ref, b5_ref, out_ref):
    h = jnp.dot(h4_ref[...], w5_ref[...], preferred_element_type=jnp.float32)
    out_ref[...] = jnp.tanh(h + b5_ref[...])   # pad lanes hold tanh(0)=0


# ----------------------------------------------------------------------------
# One-time weight preparation (pad + bf16 cast).  Call ONCE, reuse the pytree.
# ----------------------------------------------------------------------------
def prepare_params(params, img_shape):
    out_dim = math.prod(img_shape)
    out_pad = _round_up(out_dim, 128)                       # lane-dense output
    in_dim = params["w1"].shape[0]
    in_pad = _round_up(in_dim, 128)                         # clean contracting dim

    prep = {
        "emb": params["emb"].astype(jnp.float32),
        # Zero rows/cols contribute nothing: padding is exact.
        "w1": jnp.pad(params["w1"],
                      ((0, in_pad - in_dim), (0, 0))).astype(jnp.bfloat16),
        "b1": params["b1"].astype(jnp.float32),
        "w5": jnp.pad(params["w5"],
                      ((0, 0), (0, out_pad - out_dim))).astype(jnp.bfloat16),
        "b5": jnp.pad(params["b5"],
                      ((0, 0), (0, out_pad - out_dim))).astype(jnp.float32),
    }
    # b2/b3/b4 are intentionally dropped: BN mean-subtraction cancels them.
    for i in (2, 3, 4):
        prep[f"w{i}"] = params[f"w{i}"].astype(jnp.bfloat16)
        prep[f"g{i}"] = params[f"g{i}"].astype(jnp.float32)
        prep[f"be{i}"] = params[f"be{i}"].astype(jnp.float32)
    return prep


# ----------------------------------------------------------------------------
# Forward.
# ----------------------------------------------------------------------------
@functools.partial(jax.jit, static_argnums=(3,))
def generator_mlp_forward(noise, labels, prep, img_shape):
    """noise: (B, latent_dim) f32, labels: (B,) int32, prep: prepare_params()
    output, img_shape: static tuple of Python ints."""
    out_dim = math.prod(img_shape)
    out_pad = prep["w5"].shape[1]
    in_pad = prep["w1"].shape[0]

    # Embedding gather + concat (+pad/cast): cheap glue on (B, in_dim) data.
    gen_input = jnp.concatenate(
        [prep["emb"][labels], noise], axis=-1).astype(jnp.float32)
    batch, in_dim = gen_input.shape
    x = jnp.pad(gen_input, ((0, 0), (0, in_pad - in_dim))).astype(jnp.bfloat16)

    vmem = pl.BlockSpec(memory_space=pltpu.MemorySpace.VMEM)
    trunk_args = (
        x,
        prep["w1"], prep["b1"],
        prep["w2"], prep["g2"], prep["be2"],
        prep["w3"], prep["g3"], prep["be3"],
        prep["w4"], prep["g4"], prep["be4"],
    )

    trunk_flops = 2 * batch * (in_pad * 128 + 128 * 256 + 256 * 512
                               + 512 * HIDDEN)
    trunk_bytes = (sum(int(a.size) * a.dtype.itemsize for a in trunk_args)
                   + batch * HIDDEN * 2)
    h4 = pl.pallas_call(
        trunk_kernel,
        out_shape=jax.ShapeDtypeStruct((batch, HIDDEN), jnp.bfloat16),
        in_specs=[vmem] * len(trunk_args),
        out_specs=vmem,
        compiler_params=pltpu.CompilerParams(vmem_limit_bytes=VMEM_LIMIT),
        cost_estimate=pl.CostEstimate(
            flops=trunk_flops,
            transcendentals=256 + 512 + 1024,          # rsqrt per BN feature
            bytes_accessed=trunk_bytes),
    )(*trunk_args)

    tn = _pick_tile_n(out_pad)
    n_tiles = out_pad // tn
    head_flops = 2 * batch * HIDDEN * out_pad
    head_bytes = (batch * HIDDEN * 2 + HIDDEN * out_pad * 2
                  + out_pad * 4 + batch * out_pad * 4)
    img_flat = pl.pallas_call(
        head_kernel,
        out_shape=jax.ShapeDtypeStruct((batch, out_pad), jnp.float32),
        grid=(n_tiles,),
        in_specs=[
            pl.BlockSpec((batch, HIDDEN), lambda j: (0, 0)),   # resident
            pl.BlockSpec((HIDDEN, tn), lambda j: (0, j)),      # streamed W5 tile
            pl.BlockSpec((1, tn), lambda j: (0, j)),
        ],
        out_specs=pl.BlockSpec((batch, tn), lambda j: (0, j)),  # lane-dense
        compiler_params=pltpu.CompilerParams(
            dimension_semantics=("parallel",),                  # 2 TCs on v7x
            vmem_limit_bytes=VMEM_LIMIT),
        cost_estimate=pl.CostEstimate(
            flops=head_flops,
            transcendentals=batch * out_pad,                    # tanh
            bytes_accessed=head_bytes),
    )(h4, prep["w5"], prep["b5"])

    return img_flat[:, :out_dim].reshape((-1,) + tuple(img_shape))


# ----------------------------------------------------------------------------
# Synthetic parameter init (shapes match the PyTorch module).
# ----------------------------------------------------------------------------
def init_params(key, n_classes, latent_dim, img_shape):
    out_dim = math.prod(img_shape)
    dims = [latent_dim + n_classes, 128, 256, 512, 1024, out_dim]

    keys = jax.random.split(key, 16)
    params = {}
    params["emb"] = jax.random.normal(keys[0], (n_classes, n_classes), jnp.float32)

    for i in range(5):
        fan_in, fan_out = dims[i], dims[i + 1]
        scale = 1.0 / jnp.sqrt(jnp.float32(fan_in))
        params[f"w{i + 1}"] = scale * jax.random.normal(
            keys[1 + 2 * i], (fan_in, fan_out), jnp.float32)
        # Biases exist in the PyTorch module; b2/b3/b4 are cancelled by BN and
        # therefore never reach the kernels.
        params[f"b{i + 1}"] = scale * jax.random.normal(
            keys[2 + 2 * i], (1, fan_out), jnp.float32)

    # BatchNorm affine params for blocks 2..4 (PyTorch init: gamma=1, beta=0).
    for i, d in zip((2, 3, 4), (256, 512, 1024)):
        params[f"g{i}"] = jnp.ones((1, d), jnp.float32)
        params[f"be{i}"] = jnp.zeros((1, d), jnp.float32)
    return params


if __name__ == "__main__":
    n_classes = 8
    latent_dim = 16
    img_shape = (1, 8, 8)
    batch = 8

    key = jax.random.PRNGKey(0)
    k_params, k_noise, k_labels = jax.random.split(key, 3)

    params = init_params(k_params, n_classes, latent_dim, img_shape)
    prep = prepare_params(params, img_shape)            # one-time weight prep
    noise = jax.random.normal(k_noise, (batch, latent_dim), jnp.float32)
    labels = jax.random.randint(k_labels, (batch,), 0, n_classes, jnp.int32)

    img = generator_mlp_forward(noise, labels, prep, img_shape)
    jax.block_until_ready(img)

    assert img.shape == (batch,) + img_shape, img.shape
    assert bool(jnp.all(jnp.isfinite(img)))
    assert bool(jnp.all(jnp.abs(img) <= 1.0))           # tanh output range
    print("KERNEL_OK")
</pallas_src>

<mosaic_0001>
module attributes {stable_mosaic.version = 11 : i64} {
  func.func @head_kernel(%arg0: i32, %arg1: memref<8x1024xbf16, #tpu.memory_space<vmem>>, %arg2: memref<1024x128xbf16, #tpu.memory_space<vmem>>, %arg3: memref<1x128xf32, #tpu.memory_space<vmem>>, %arg4: memref<8x128xf32, #tpu.memory_space<vmem>>) attributes {dimension_semantics = [#tpu.dimension_semantics<parallel>], iteration_bounds = array<i64: 1>, scalar_prefetch = 0 : i64, scratch_operands = 0 : i64, tpu.core_type = #tpu.core_type<tc>, window_params = [{pipeline_mode = #tpu.pipeline_mode<synchronous>, transform_indices = @transform_0, window_bounds = array<i64: 8, 1024>}, {transform_indices = @transform_1, window_bounds = array<i64: 1024, 128>}, {transform_indices = @transform_2, window_bounds = array<i64: 1, 128>}, {transform_indices = @transform_3, window_bounds = array<i64: 8, 128>}]} {
    %c0 = arith.constant 0 : index
    %c0_0 = arith.constant 0 : index
    %0 = vector.load %arg1[%c0, %c0_0] : memref<8x1024xbf16, #tpu.memory_space<vmem>>, vector<8x1024xbf16>
    %c0_1 = arith.constant 0 : index
    %c0_2 = arith.constant 0 : index
    %1 = vector.load %arg2[%c0_1, %c0_2] : memref<1024x128xbf16, #tpu.memory_space<vmem>>, vector<1024x128xbf16>
    %cst = arith.constant dense<0.000000e+00> : vector<8x128xf32>
    %2 = tpu.matmul %0, %1, %cst {dimension_numbers = #tpu.dot_dimension_numbers<[1], [0], [0], [1], [0, 0, 1, 1], [], []>} : vector<8x1024xbf16>, vector<1024x128xbf16>, vector<8x128xf32> -> vector<8x128xf32>
    %c0_3 = arith.constant 0 : index
    %c0_4 = arith.constant 0 : index
    %3 = vector.load %arg3[%c0_3, %c0_4] : memref<1x128xf32, #tpu.memory_space<vmem>>, vector<1x128xf32>
    %4 = vector.broadcast %3 : vector<1x128xf32> to vector<8x128xf32>
    %5 = arith.addf %2, %4 : vector<8x128xf32>
    %6 = math.tanh %5 : vector<8x128xf32>
    %c0_5 = arith.constant 0 : index
    %c0_6 = arith.constant 0 : index
    %7 = vector.load %arg4[%c0_5, %c0_6] : memref<8x128xf32, #tpu.memory_space<vmem>>, vector<8x128xf32>
    tpu.vector_store %arg4[%c0_5, %c0_6], %6 {strides = array<i32>} : memref<8x128xf32, #tpu.memory_space<vmem>>, vector<8x128xf32>,
    return
  }
  func.func @transform_0(%arg0: i32) -> (i32, i32) {
    %c0_i32 = arith.constant 0 : i32
    %c0_i32_0 = arith.constant 0 : i32
    %c0_i32_1 = arith.constant 0 : i32
    return %c0_i32, %c0_i32_0 : i32, i32
  }
  func.func @transform_1(%arg0: i32) -> (i32, i32) {
    %c0_i32 = arith.constant 0 : i32
    %c0_i32_0 = arith.constant 0 : i32
    return %c0_i32, %arg0 : i32, i32
  }
  func.func @transform_2(%arg0: i32) -> (i32, i32) {
    %c0_i32 = arith.constant 0 : i32
    %c0_i32_0 = arith.constant 0 : i32
    return %c0_i32, %arg0 : i32, i32
  }
  func.func @transform_3(%arg0: i32) -> (i32, i32) {
    %c0_i32 = arith.constant 0 : i32
    %c0_i32_0 = arith.constant 0 : i32
    return %c0_i32, %arg0 : i32, i32
  }
}

module attributes {stable_mosaic.version = 11 : i64} {
  func.func @trunk_kernel(%arg0: memref<8x128xbf16, #tpu.memory_space<vmem>>, %arg1: memref<128x128xbf16, #tpu.memory_space<vmem>>, %arg2: memref<1x128xf32, #tpu.memory_space<vmem>>, %arg3: memref<128x256xbf16, #tpu.memory_space<vmem>>, %arg4: memref<1x256xf32, #tpu.memory_space<vmem>>, %arg5: memref<1x256xf32, #tpu.memory_space<vmem>>, %arg6: memref<256x512xbf16, #tpu.memory_space<vmem>>, %arg7: memref<1x512xf32, #tpu.memory_space<vmem>>, %arg8: memref<1x512xf32, #tpu.memory_space<vmem>>, %arg9: memref<512x1024xbf16, #tpu.memory_space<vmem>>, %arg10: memref<1x1024xf32, #tpu.memory_space<vmem>>, %arg11: memref<1x1024xf32, #tpu.memory_space<vmem>>, %arg12: memref<8x1024xbf16, #tpu.memory_space<vmem>>) attributes {dimension_semantics = [], scalar_prefetch = 0 : i64, scratch_operands = 0 : i64, tpu.core_type = #tpu.core_type<tc>} {
    %c0 = arith.constant 0 : index
    %c0_0 = arith.constant 0 : index
    %0 = vector.load %arg0[%c0, %c0_0] : memref<8x128xbf16, #tpu.memory_space<vmem>>, vector<8x128xbf16>
    %c0_1 = arith.constant 0 : index
    %c0_2 = arith.constant 0 : index
    %1 = vector.load %arg1[%c0_1, %c0_2] : memref<128x128xbf16, #tpu.memory_space<vmem>>, vector<128x128xbf16>
    %cst = arith.constant dense<0.000000e+00> : vector<8x128xf32>
    %2 = tpu.matmul %0, %1, %cst {dimension_numbers = #tpu.dot_dimension_numbers<[1], [0], [0], [1], [0, 0, 1, 1], [], []>} : vector<8x128xbf16>, vector<128x128xbf16>, vector<8x128xf32> -> vector<8x128xf32>
    %c0_3 = arith.constant 0 : index
    %c0_4 = arith.constant 0 : index
    %3 = vector.load %arg2[%c0_3, %c0_4] : memref<1x128xf32, #tpu.memory_space<vmem>>, vector<1x128xf32>
    %4 = vector.broadcast %3 : vector<1x128xf32> to vector<8x128xf32>
    %5 = arith.addf %2, %4 : vector<8x128xf32>
    %cst_5 = arith.constant 0.000000e+00 : f32
    %6 = vector.broadcast %cst_5 : f32 to vector<8x128xf32>
    %7 = arith.cmpf ogt, %5, %6 : vector<8x128xf32>
    %cst_6 = arith.constant 2.000000e-01 : f32
    %8 = vector.broadcast %cst_6 : f32 to vector<8x128xf32>
    %9 = arith.mulf %8, %5 : vector<8x128xf32>
    %10 = arith.select %7, %5, %9 : vector<8x128xi1>, vector<8x128xf32>
    %11 = arith.truncf %10 : vector<8x128xf32> to vector<8x128xbf16>
    %c0_7 = arith.constant 0 : index
    %c0_8 = arith.constant 0 : index
    %12 = vector.load %arg3[%c0_7, %c0_8] : memref<128x256xbf16, #tpu.memory_space<vmem>>, vector<128x256xbf16>
    %cst_9 = arith.constant dense<0.000000e+00> : vector<8x256xf32>
    %13 = tpu.matmul %11, %12, %cst_9 {dimension_numbers = #tpu.dot_dimension_numbers<[1], [0], [0], [1], [0, 0, 1, 1], [], []>} : vector<8x128xbf16>, vector<128x256xbf16>, vector<8x256xf32> -> vector<8x256xf32>
    %c0_10 = arith.constant 0 : index
    %c0_11 = arith.constant 0 : index
    %14 = vector.load %arg4[%c0_10, %c0_11] : memref<1x256xf32, #tpu.memory_space<vmem>>, vector<1x256xf32>
    %c0_12 = arith.constant 0 : index
    %c0_13 = arith.constant 0 : index
    %15 = vector.load %arg5[%c0_12, %c0_13] : memref<1x256xf32, #tpu.memory_space<vmem>>, vector<1x256xf32>
    %cst_14 = arith.constant dense<0.000000e+00> : vector<256xf32>
    %16 = vector.multi_reduction <add>, %13, %cst_14 [0] : vector<8x256xf32> to vector<256xf32>
    %17 = vector.shape_cast %16 : vector<256xf32> to vector<1x256xf32>
    %cst_15 = arith.constant 1.250000e-01 : f32
    %18 = vector.broadcast %cst_15 : f32 to vector<1x256xf32>
    %19 = arith.mulf %17, %18 : vector<1x256xf32>
    %20 = vector.broadcast %19 : vector<1x256xf32> to vector<8x256xf32>
    %21 = arith.subf %13, %20 : vector<8x256xf32>
    %22 = arith.mulf %21, %21 : vector<8x256xf32>
    %cst_16 = arith.constant dense<0.000000e+00> : vector<256xf32>
    %23 = vector.multi_reduction <add>, %22, %cst_16 [0] : vector<8x256xf32> to vector<256xf32>
    %24 = vector.shape_cast %23 : vector<256xf32> to vector<1x256xf32>
    %cst_17 = arith.constant 1.250000e-01 : f32
    %25 = vector.broadcast %cst_17 : f32 to vector<1x256xf32>
    %26 = arith.mulf %24, %25 : vector<1x256xf32>
    %cst_18 = arith.constant 9.99999974E-6 : f32
    %27 = vector.broadcast %cst_18 : f32 to vector<1x256xf32>
    %28 = arith.addf %26, %27 : vector<1x256xf32>
    %29 = math.rsqrt %28 : vector<1x256xf32>
    %30 = arith.mulf %14, %29 : vector<1x256xf32>
    %31 = vector.broadcast %30 : vector<1x256xf32> to vector<8x256xf32>
    %32 = arith.mulf %21, %31 : vector<8x256xf32>
    %33 = vector.broadcast %15 : vector<1x256xf32> to vector<8x256xf32>
    %34 = arith.addf %32, %33 : vector<8x256xf32>
    %cst_19 = arith.constant 0.000000e+00 : f32
    %35 = vector.broadcast %cst_19 : f32 to vector<8x256xf32>
    %36 = arith.cmpf ogt, %34, %35 : vector<8x256xf32>
    %cst_20 = arith.constant 2.000000e-01 : f32
    %37 = vector.broadcast %cst_20 : f32 to vector<8x256xf32>
    %38 = arith.mulf %37, %34 : vector<8x256xf32>
    %39 = arith.select %36, %34, %38 : vector<8x256xi1>, vector<8x256xf32>
    %40 = arith.truncf %39 : vector<8x256xf32> to vector<8x256xbf16>
    %c0_21 = arith.constant 0 : index
    %c0_22 = arith.constant 0 : index
    %41 = vector.load %arg6[%c0_21, %c0_22] : memref<256x512xbf16, #tpu.memory_space<vmem>>, vector<256x512xbf16>
    %cst_23 = arith.constant dense<0.000000e+00> : vector<8x512xf32>
    %42 = tpu.matmul %40, %41, %cst_23 {dimension_numbers = #tpu.dot_dimension_numbers<[1], [0], [0], [1], [0, 0, 1, 1], [], []>} : vector<8x256xbf16>, vector<256x512xbf16>, vector<8x512xf32> -> vector<8x512xf32>
    %c0_24 = arith.constant 0 : index
    %c0_25 = arith.constant 0 : index
    %43 = vector.load %arg7[%c0_24, %c0_25] : memref<1x512xf32, #tpu.memory_space<vmem>>, vector<1x512xf32>
    %c0_26 = arith.constant 0 : index
    %c0_27 = arith.constant 0 : index
    %44 = vector.load %arg8[%c0_26, %c0_27] : memref<1x512xf32, #tpu.memory_space<vmem>>, vector<1x512xf32>
    %cst_28 = arith.constant dense<0.000000e+00> : vector<512xf32>
    %45 = vector.multi_reduction <add>, %42, %cst_28 [0] : vector<8x512xf32> to vector<512xf32>
    %46 = vector.shape_cast %45 : vector<512xf32> to vector<1x512xf32>
    %cst_29 = arith.constant 1.250000e-01 : f32
    %47 = vector.broadcast %cst_29 : f32 to vector<1x512xf32>
    %48 = arith.mulf %46, %47 : vector<1x512xf32>
    %49 = vector.broadcast %48 : vector<1x512xf32> to vector<8x512xf32>
    %50 = arith.subf %42, %49 : vector<8x512xf32>
    %51 = arith.mulf %50, %50 : vector<8x512xf32>
    %cst_30 = arith.constant dense<0.000000e+00> : vector<512xf32>
    %52 = vector.multi_reduction <add>, %51, %cst_30 [0] : vector<8x512xf32> to vector<512xf32>
    %53 = vector.shape_cast %52 : vector<512xf32> to vector<1x512xf32>
    %cst_31 = arith.constant 1.250000e-01 : f32
    %54 = vector.broadcast %cst_31 : f32 to vector<1x512xf32>
    %55 = arith.mulf %53, %54 : vector<1x512xf32>
    %cst_32 = arith.constant 9.99999974E-6 : f32
    %56 = vector.broadcast %cst_32 : f32 to vector<1x512xf32>
    %57 = arith.addf %55, %56 : vector<1x512xf32>
    %58 = math.rsqrt %57 : vector<1x512xf32>
    %59 = arith.mulf %43, %58 : vector<1x512xf32>
    %60 = vector.broadcast %59 : vector<1x512xf32> to vector<8x512xf32>
    %61 = arith.mulf %50, %60 : vector<8x512xf32>
    %62 = vector.broadcast %44 : vector<1x512xf32> to vector<8x512xf32>
    %63 = arith.addf %61, %62 : vector<8x512xf32>
    %cst_33 = arith.constant 0.000000e+00 : f32
    %64 = vector.broadcast %cst_33 : f32 to vector<8x512xf32>
    %65 = arith.cmpf ogt, %63, %64 : vector<8x512xf32>
    %cst_34 = arith.constant 2.000000e-01 : f32
    %66 = vector.broadcast %cst_34 : f32 to vector<8x512xf32>
    %67 = arith.mulf %66, %63 : vector<8x512xf32>
    %68 = arith.select %65, %63, %67 : vector<8x512xi1>, vector<8x512xf32>
    %69 = arith.truncf %68 : vector<8x512xf32> to vector<8x512xbf16>
    %c0_35 = arith.constant 0 : index
    %c0_36 = arith.constant 0 : index
    %70 = vector.load %arg9[%c0_35, %c0_36] : memref<512x1024xbf16, #tpu.memory_space<vmem>>, vector<512x1024xbf16>
    %cst_37 = arith.constant dense<0.000000e+00> : vector<8x1024xf32>
    %71 = tpu.matmul %69, %70, %cst_37 {dimension_numbers = #tpu.dot_dimension_numbers<[1], [0], [0], [1], [0, 0, 1, 1], [], []>} : vector<8x512xbf16>, vector<512x1024xbf16>, vector<8x1024xf32> -> vector<8x1024xf32>
    %c0_38 = arith.constant 0 : index
    %c0_39 = arith.constant 0 : index
    %72 = vector.load %arg10[%c0_38, %c0_39] : memref<1x1024xf32, #tpu.memory_space<vmem>>, vector<1x1024xf32>
    %c0_40 = arith.constant 0 : index
    %c0_41 = arith.constant 0 : index
    %73 = vector.load %arg11[%c0_40, %c0_41] : memref<1x1024xf32, #tpu.memory_space<vmem>>, vector<1x1024xf32>
    %cst_42 = arith.constant dense<0.000000e+00> : vector<1024xf32>
    %74 = vector.multi_reduction <add>, %71, %cst_42 [0] : vector<8x1024xf32> to vector<1024xf32>
    %75 = vector.shape_cast %74 : vector<1024xf32> to vector<1x1024xf32>
    %cst_43 = arith.constant 1.250000e-01 : f32
    %76 = vector.broadcast %cst_43 : f32 to vector<1x1024xf32>
    %77 = arith.mulf %75, %76 : vector<1x1024xf32>
    %78 = vector.broadcast %77 : vector<1x1024xf32> to vector<8x1024xf32>
    %79 = arith.subf %71, %78 : vector<8x1024xf32>
    %80 = arith.mulf %79, %79 : vector<8x1024xf32>
    %cst_44 = arith.constant dense<0.000000e+00> : vector<1024xf32>
    %81 = vector.multi_reduction <add>, %80, %cst_44 [0] : vector<8x1024xf32> to vector<1024xf32>
    %82 = vector.shape_cast %81 : vector<1024xf32> to vector<1x1024xf32>
    %cst_45 = arith.constant 1.250000e-01 : f32
    %83 = vector.broadcast %cst_45 : f32 to vector<1x1024xf32>
    %84 = arith.mulf %82, %83 : vector<1x1024xf32>
    %cst_46 = arith.constant 9.99999974E-6 : f32
    %85 = vector.broadcast %cst_46 : f32 to vector<1x1024xf32>
    %86 = arith.addf %84, %85 : vector<1x1024xf32>
    %87 = math.rsqrt %86 : vector<1x1024xf32>
    %88 = arith.mulf %72, %87 : vector<1x1024xf32>
    %89 = vector.broadcast %88 : vector<1x1024xf32> to vector<8x1024xf32>
    %90 = arith.mulf %79, %89 : vector<8x1024xf32>
    %91 = vector.broadcast %73 : vector<1x1024xf32> to vector<8x1024xf32>
    %92 = arith.addf %90, %91 : vector<8x1024xf32>
    %cst_47 = arith.constant 0.000000e+00 : f32
    %93 = vector.broadcast %cst_47 : f32 to vector<8x1024xf32>
    %94 = arith.cmpf ogt, %92, %93 : vector<8x1024xf32>
    %cst_48 = arith.constant 2.000000e-01 : f32
    %95 = vector.broadcast %cst_48 : f32 to vector<8x1024xf32>
    %96 = arith.mulf %95, %92 : vector<8x1024xf32>
    %97 = arith.select %94, %92, %96 : vector<8x1024xi1>, vector<8x1024xf32>
    %98 = arith.truncf %97 : vector<8x1024xf32> to vector<8x1024xbf16>
    %c0_49 = arith.constant 0 : index
    %c0_50 = arith.constant 0 : index
    %99 = vector.load %arg12[%c0_49, %c0_50] : memref<8x1024xbf16, #tpu.memory_space<vmem>>, vector<8x1024xbf16>
    tpu.vector_store %arg12[%c0_49, %c0_50], %98 {strides = array<i32>} : memref<8x1024xbf16, #tpu.memory_space<vmem>>, vector<8x1024xbf16>,
    return
  }
}

</mosaic_0001>

<bundles_post_ra>
// kernel: generator_mlp_forward.3
= control target key start
LH: loop header
LB: loop body
LE: loop exit
PB: predicated region body
PF: predicated region fallthrough
CT: control target
= control target key end

     0   :  { %s1197_s1 = inlined_call_operand.vmem [shape: bf16[1024,128], index: 1, kind: input, shape index: {}]   ;;  %s1198_s0 = inlined_call_operand.vmem [shape: bf16[8,1024], index: 0, kind: input, shape index: {}]   ;;  %s1199_s2 = inlined_call_operand.vmem [shape: f32[1,128], index: 2, kind: input, shape index: {}]   ;;  %s1200_s3 = inlined_call_operand.vmem [shape: f32[8,128], index: 3, kind: output, shape index: {}]  }
   0x1   :  { %v893_v0 = vld [vmem:[%s1197_s1 + $0x40] sm:$0xff]   ;;  %v897_v4 = vld [vmem:[%s1197_s1 + $0x48] sm:$0xff]   ;;  %v901_v8 = vld [vmem:[%s1197_s1 + $0x50] sm:$0xff]  }
   0x2   :  { %v894_v1 = vld [vmem:[%s1197_s1 + $0xc0] sm:$0xff]   ;;  %805 = vmatprep.subr.bf16.mxu0 %v893_v0  ;;  %v898_v5 = vld [vmem:[%s1197_s1 + $0xc8] sm:$0xff]   ;;  %v902_v9 = vld [vmem:[%s1197_s1 + $0xd0] sm:$0xff]  }
   0x3   :  { %v895_v2 = vld [vmem:[%s1197_s1] sm:$0xff]   ;;  %827 = vmatprep.subr.bf16.mxu1 %v894_v1  ;;  %v899_v6 = vld [vmem:[%s1197_s1 + $0x8] sm:$0xff]   ;;  %v903_v10 = vld [vmem:[%s1197_s1 + $0x10] sm:$0xff]  }
   0x4   :  { %v896_v3 = vld [vmem:[%s1197_s1 + $0x80] sm:$0xff]   ;;  %806 = vmatpush3.bf16.msra.mxu0 %v895_v2  ;;  %v900_v7 = vld [vmem:[%s1197_s1 + $0x88] sm:$0xff]   ;;  %v904_v11 = vld [vmem:[%s1197_s1 + $0x90] sm:$0xff]  }
   0x5   :  { %828 = vmatpush3.bf16.msra.mxu1 %v896_v3  ;;  %807 = vmatprep.subr.bf16.mxu0 %v897_v4  ;;  %v905_v12 = vld [vmem:[%s1197_s1 + $0x58] sm:$0xff]   ;;  %v909_v16 = vld [vmem:[%s1197_s1 + $0x60] sm:$0xff]   ;;  %v913_v20 = vld [vmem:[%s1197_s1 + $0x68] sm:$0xff]  }
   0x6   :  { %829 = vmatprep.subr.bf16.mxu1 %v898_v5  ;;  %v906_v13 = vld [vmem:[%s1197_s1 + $0xd8] sm:$0xff]   ;;  %v910_v17 = vld [vmem:[%s1197_s1 + $0xe0] sm:$0xff]   ;;  %v914_v21 = vld [vmem:[%s1197_s1 + $0xe8] sm:$0xff]  }
   0x7   :  { %v907_v14 = vld [vmem:[%s1197_s1 + $0x18] sm:$0xff]   ;;  %v911_v18 = vld [vmem:[%s1197_s1 + $0x20] sm:$0xff]   ;;  %v915_v22 = vld [vmem:[%s1197_s1 + $0x28] sm:$0xff]  }
   0x8   :  { %808 = vmatpush3.bf16.msra.mxu0 %v899_v6  ;;  %v908_v15 = vld [vmem:[%s1197_s1 + $0x98] sm:$0xff]   ;;  %v912_v19 = vld [vmem:[%s1197_s1 + $0xa0] sm:$0xff]   ;;  %v916_v23 = vld [vmem:[%s1197_s1 + $0xa8] sm:$0xff]  }
   0x9   :  { %830 = vmatpush3.bf16.msra.mxu1 %v900_v7  ;;  %809 = vmatprep.subr.bf16.mxu0 %v901_v8  ;;  %v917_v24 = vld [vmem:[%s1197_s1 + $0x70] sm:$0xff]   ;;  %v921_v28 = vld [vmem:[%s1197_s1 + $0x78] sm:$0xff]   ;;  %v15_v32 = vld [vmem:[%s1198_s0] sm:$0xff] }
   0xa   :  { %831 = vmatprep.subr.bf16.mxu1 %v902_v9  ;;  %v918_v25 = vld [vmem:[%s1197_s1 + $0xf0] sm:$0xff]   ;;  %v922_v29 = vld [vmem:[%s1197_s1 + $0xf8] sm:$0xff]   ;;  %v16_v33 = vld [vmem:[%s1198_s0 + $0x8] sm:$0xff]  ;;  %v733_v34 = vcombine.low %v15_v32, %v15_v32  ;;  %v734_v35 = vcombine.high %v15_v32, %v15_v32 }
   0xb   :  { %v919_v26 = vld [vmem:[%s1197_s1 + $0x30] sm:$0xff]   ;;  %v923_v30 = vld [vmem:[%s1197_s1 + $0x38] sm:$0xff]   ;;  %v735_v36 = vcombine.low %v16_v33, %v16_v33  ;;  %v736_v37 = vcombine.high %v16_v33, %v16_v33  ;;  %v929_v38 = vld [vmem:[%s1197_s1 + $0x140] sm:$0xff]  }
   0xc   :  { %810 = vmatpush3.bf16.msra.mxu0 %v903_v10  ;;  %v920_v27 = vld [vmem:[%s1197_s1 + $0xb0] sm:$0xff]   ;;  %v924_v31 = vld [vmem:[%s1197_s1 + $0xb8] sm:$0xff]   ;;  %v930_v39 = vld [vmem:[%s1197_s1 + $0x1c0] sm:$0xff]   ;;  %598 = vmatprep.mubr.bf16.mxu0 %v734_v35 }
   0xd   :  { %832 = vmatpush3.bf16.msra.mxu1 %v904_v11  ;;  %811 = vmatprep.subr.bf16.mxu0 %v905_v12  ;;  %v931_v40 = vld [vmem:[%s1197_s1 + $0x100] sm:$0xff]   ;;  %v933_v42 = vld [vmem:[%s1197_s1 + $0x148] sm:$0xff]   ;;  %v937_v46 = vld [vmem:[%s1197_s1 + $0x150] sm:$0xff]  }
   0xe   :  { %833 = vmatprep.subr.bf16.mxu1 %v906_v13  ;;  %638 = vmatprep.mubr.bf16.mxu1 %v736_v37  ;;  %v932_v41 = vld [vmem:[%s1197_s1 + $0x180] sm:$0xff]   ;;  %v934_v43 = vld [vmem:[%s1197_s1 + $0x1c8] sm:$0xff]   ;;  %v938_v47 = vld [vmem:[%s1197_s1 + $0x1d0] sm:$0xff]  }
   0xf   :  { %v935_v44 = vld [vmem:[%s1197_s1 + $0x108] sm:$0xff]   ;;  %v939_v48 = vld [vmem:[%s1197_s1 + $0x110] sm:$0xff]   ;;  %v941_v50 = vld [vmem:[%s1197_s1 + $0x158] sm:$0xff]  }
  0x10   :  { %812 = vmatpush3.bf16.msra.mxu0 %v907_v14  ;;  %v936_v45 = vld [vmem:[%s1197_s1 + $0x188] sm:$0xff]   ;;  %v940_v49 = vld [vmem:[%s1197_s1 + $0x190] sm:$0xff]   ;;  %v942_v51 = vld [vmem:[%s1197_s1 + $0x1d8] sm:$0xff]  }
  0x11   :  { %834 = vmatpush3.bf16.msra.mxu1 %v908_v15  ;;  %813 = vmatprep.subr.bf16.mxu0 %v909_v16  ;;  %v943_v52 = vld [vmem:[%s1197_s1 + $0x118] sm:$0xff]   ;;  %v945_v54 = vld [vmem:[%s1197_s1 + $0x160] sm:$0xff]   ;;  %v949_v58 = vld [vmem:[%s1197_s1 + $0x168] sm:$0xff]  }
  0x12   :  { %835 = vmatprep.subr.bf16.mxu1 %v910_v17  ;;  %v944_v53 = vld [vmem:[%s1197_s1 + $0x198] sm:$0xff]   ;;  %v946_v55 = vld [vmem:[%s1197_s1 + $0x1e0] sm:$0xff]   ;;  %v950_v59 = vld [vmem:[%s1197_s1 + $0x1e8] sm:$0xff]  }
  0x13   :  { %v947_v56 = vld [vmem:[%s1197_s1 + $0x120] sm:$0xff]   ;;  %v951_v60 = vld [vmem:[%s1197_s1 + $0x128] sm:$0xff]   ;;  %v953_v62 = vld [vmem:[%s1197_s1 + $0x170] sm:$0xff]  }
  0x14   :  { %814 = vmatpush3.bf16.msra.mxu0 %v911_v18  ;;  %v948_v57 = vld [vmem:[%s1197_s1 + $0x1a0] sm:$0xff]   ;;  %v952_v61 = vld [vmem:[%s1197_s1 + $0x1a8] sm:$0xff]   ;;  %v954_v63 = vld [vmem:[%s1197_s1 + $0x1f0] sm:$0xff]  }
  0x15   :  { %836 = vmatpush3.bf16.msra.mxu1 %v912_v19  ;;  %815 = vmatprep.subr.bf16.mxu0 %v913_v20  ;;  %v955_v0 = vld [vmem:[%s1197_s1 + $0x130] sm:$0xff]   ;;  %v957_v2 = vld [vmem:[%s1197_s1 + $0x178] sm:$0xff]   ;;  %v732_v14 = vld [vmem:[%s1199_s2] ss:$0 sm:$0xff] }
  0x16   :  { %837 = vmatprep.subr.bf16.mxu1 %v914_v21  ;;  %v956_v1 = vld [vmem:[%s1197_s1 + $0x1b0] sm:$0xff]   ;;  %v958_v3 = vld [vmem:[%s1197_s1 + $0x1f8] sm:$0xff]  }
  0x17   :  { %v959_v4 = vld [vmem:[%s1197_s1 + $0x138] sm:$0xff]   ;;  %v17_v6 = vld [vmem:[%s1198_s0 + $0x10] sm:$0xff] }
  0x18   :  { %816 = vmatpush3.bf16.msra.mxu0 %v915_v22  ;;  %v960_v5 = vld [vmem:[%s1197_s1 + $0x1b8] sm:$0xff]   ;;  %v737_v7 = vcombine.low %v17_v6, %v17_v6  ;;  %v738_v8 = vcombine.high %v17_v6, %v17_v6 }
  0x19   :  { %838 = vmatpush3.bf16.msra.mxu1 %v916_v23  ;;  %817 = vmatprep.subr.bf16.mxu0 %v917_v24  ;;  %v18_v9 = vld [vmem:[%s1198_s0 + $0x18] sm:$0xff] }
  0x1a   :  { %839 = vmatprep.subr.bf16.mxu1 %v918_v25  ;;  %v739_v10 = vcombine.low %v18_v9, %v18_v9  ;;  %v740_v11 = vcombine.high %v18_v9, %v18_v9 }
  0x1c   :  { %818 = vmatpush3.bf16.msra.mxu0 %v919_v26 }
  0x1d   :  { %840 = vmatpush3.bf16.msra.mxu1 %v920_v27  ;;  %819 = vmatprep.subr.bf16.mxu0 %v921_v28 }
  0x1e   :  { %841 = vmatprep.subr.bf16.mxu1 %v922_v29 }
  0x20   :  { %820 = vmatpush3.bf16.msra.mxu0 %v923_v30 }
  0x21   :  { %842 = vmatpush3.bf16.msra.mxu1 %v924_v31  ;;  %849 = vmatprep.subr.bf16.mxu0 %v929_v38 }
  0x22   :  { %871 = vmatprep.subr.bf16.mxu1 %v930_v39 }
  0x23   :  { %599 = vmatmul.mubr.bf16.vlgmr.msra.gmra.mrb[0].mxu0 %v733_v34 }
  0x24   :  { %639 = vmatmul.mubr.bf16.vlgmr.msra.gmra.mrb[0].mxu1 %v735_v36  ;;  %850 = vmatpush3.bf16.msra.mxu0 %v931_v40 }
  0x25   :  { %872 = vmatpush3.bf16.msra.mxu1 %v932_v41  ;;  %851 = vmatprep.subr.bf16.mxu0 %v933_v42 }
  0x26   :  { %873 = vmatprep.subr.bf16.mxu1 %v934_v43  ;;  %678 = vmatprep.mubr.bf16.mxu0 %v738_v8 }
  0x27   :  { %718 = vmatprep.mubr.bf16.mxu1 %v740_v11 }
  0x28   :  { %852 = vmatpush3.bf16.msra.mxu0 %v935_v44 }
  0x29   :  { %874 = vmatpush3.bf16.msra.mxu1 %v936_v45  ;;  %853 = vmatprep.subr.bf16.mxu0 %v937_v46 }
  0x2a   :  { %875 = vmatprep.subr.bf16.mxu1 %v938_v47 }
  0x2c   :  { %854 = vmatpush3.bf16.msra.mxu0 %v939_v48 }
  0x2d   :  { %876 = vmatpush3.bf16.msra.mxu1 %v940_v49  ;;  %855 = vmatprep.subr.bf16.mxu0 %v941_v50 }
  0x2e   :  { %877 = vmatprep.subr.bf16.mxu1 %v942_v51 }
  0x30   :  { %856 = vmatpush3.bf16.msra.mxu0 %v943_v52 }
  0x31   :  { %878 = vmatpush3.bf16.msra.mxu1 %v944_v53  ;;  %857 = vmatprep.subr.bf16.mxu0 %v945_v54 }
  0x32   :  { %879 = vmatprep.subr.bf16.mxu1 %v946_v55 }
  0x34   :  { %858 = vmatpush3.bf16.msra.mxu0 %v947_v56 }
  0x35   :  { %880 = vmatpush3.bf16.msra.mxu1 %v948_v57  ;;  %859 = vmatprep.subr.bf16.mxu0 %v949_v58 }
  0x36   :  { %881 = vmatprep.subr.bf16.mxu1 %v950_v59 }
  0x38   :  { %860 = vmatpush3.bf16.msra.mxu0 %v951_v60 }
  0x39   :  { %882 = vmatpush3.bf16.msra.mxu1 %v952_v61  ;;  %861 = vmatprep.subr.bf16.mxu0 %v953_v62 }
  0x3a   :  { %883 = vmatprep.subr.bf16.mxu1 %v954_v63 }
  0x3c   :  { %862 = vmatpush3.bf16.msra.mxu0 %v955_v0 }
  0x3d   :  { %884 = vmatpush3.bf16.msra.mxu1 %v956_v1  ;;  %863 = vmatprep.subr.bf16.mxu0 %v957_v2 }
  0x3e   :  { %885 = vmatprep.subr.bf16.mxu1 %v958_v3 }
  0x40   :  { %864 = vmatpush3.bf16.msra.mxu0 %v959_v4 }
  0x41   :  { %886 = vmatpush3.bf16.msra.mxu1 %v960_v5 }
  0x43   :  { %679 = vmatmul.mubr.bf16.vlgmr.msra.gmra.mrb[4].mxu0 %v737_v7 }
  0x44   :  { %719 = vmatmul.mubr.bf16.vlgmr.msra.gmra.mrb[4].mxu1 %v739_v10 }
  0xf6   :  { %v821_v12 = vpop.f32.mrb[0].mxu0 }
  0xf7   :  { %v843_v13 = vpop.f32.mrb[0].mxu1  ;;  %v822_v15 = vpop.f32.mrb[1].mxu0 }
  0xf8   :  { %v844_v16 = vpop.f32.mrb[1].mxu1  ;;  %v823_v17 = vadd.f32 %v822_v15, %v821_v12  ;;  %v824_v19 = vpop.f32.mrb[2].mxu0 }
  0xf9   :  { %v845_v18 = vadd.f32 %v844_v16, %v843_v13  ;;  %v846_v20 = vpop.f32.mrb[2].mxu1  ;;  %v825_v21 = vpop.f32.mrb[3].mxu0 }
  0xfa   :  { %v847_v22 = vpop.f32.mrb[3].mxu1  ;;  %v601_v23 = vadd.f32 %v823_v17, %v732_v14 }
  0xfc   :  { %v641_v24 = vadd.f32 %v845_v18, %v601_v23 }
 0x116   :  { %v865_v25 = vpop.f32.mrb[4].mxu0 }
 0x117   :  { %v887_v26 = vpop.f32.mrb[4].mxu1  ;;  %v866_v27 = vpop.f32.mrb[5].mxu0 }
 0x118   :  { %v888_v28 = vpop.f32.mrb[5].mxu1  ;;  %v867_v29 = vadd.f32 %v866_v27, %v865_v25  ;;  %v868_v31 = vpop.f32.mrb[6].mxu0 }
 0x119   :  { %v889_v30 = vadd.f32 %v888_v28, %v887_v26  ;;  %v890_v32 = vpop.f32.mrb[6].mxu1  ;;  %v869_v33 = vpop.f32.mrb[7].mxu0 }
 0x11a   :  { %v891_v34 = vpop.f32.mrb[7].mxu1  ;;  %v681_v35 = vadd.f32 %v867_v29, %v641_v24 }
 0x11c   :  { %v721_v36 = vadd.f32 %v889_v30, %v681_v35 }
 0x11e   :  { %965 = vtanh.f32 %v721_v36 }
 0x128   :  { %v966_v37 = vpop.eup %965 }
 0x129   :  { %727 = vst [vmem:[%s1200_s3] sm:$0xff] %v966_v37 }

// kernel: generator_mlp_forward.2
= control target key start
LH: loop header
LB: loop body
LE: loop exit
PB: predicated region body
PF: predicated region fallthrough
CT: control target
= control target key end

     0   :  { %17 = vsyncpa [#allocation3], 0  ;;  %s4287_s0 = inlined_call_operand.vmem [shape: bf16[8,128], index: 0, kind: input, shape index: {}]   ;;  %s4288_s1 = inlined_call_operand.vmem [shape: bf16[128,128], index: 1, kind: input, shape index: {}]   ;;  %s4289_s2 = inlined_call_operand.vmem [shape: f32[1,128], index: 2, kind: input, shape index: {}]   ;;  %s4290_s3 = inlined_call_operand.hbm [shape: bf16[128,256], index: 3, kind: input, shape index: {}]   ;;  %s4291_s4 = inlined_call_operand.vmem [shape: f32[1,256], index: 4, kind: input, shape index: {}]   ;;  %s4292_s5 = inlined_call_operand.vmem [shape: f32[1,256], index: 5, kind: input, shape index: {}]   ;;  %s4293_s6 = inlined_call_operand.hbm [shape: bf16[256,512], index: 6, kind: input, shape index: {}]   ;;  %s4294_s7 = inlined_call_operand.vmem [shape: f32[1,512], index: 7, kind: input, shape index: {}]   ;;  %s4295_s8 = inlined_call_operand.vmem [shape: f32[1,512], index: 8, kind: input, shape index: {}]   ;;  %s4296_s9 = inlined_call_operand.hbm [shape: bf16[512,1024], index: 9, kind: input, shape index: {}]   ;;  %s4297_s10 = inlined_call_operand.vmem [shape: f32[1,1024], index: 10, kind: input, shape index: {}]   ;;  %s4298_s11 = inlined_call_operand.vmem [shape: f32[1,1024], index: 11, kind: input, shape index: {}]   ;;  %s4299_s12 = inlined_call_operand.vmem [shape: bf16[8,1024], index: 12, kind: output, shape index: {}]  }
   0x1   :  { %18 = vsyncpa [#allocation5], 0  ;;  %s3933_s21 = smov [#allocation4]   ;;  %s3863_s25 = scalar_lea.hbm %s4293_s6, 8192 }
   0x2   :  { %s46_s22 = sshll.u32 %s3933_s21, 4  ;;  %p3864_p0 = scmp.ne.s32.totalorder %s4293_s6, %s3863_s25  ;;  %s47_s22 = int_to_ptr.vmem [resolvable:$true] %s46_s22 }
   0x3   :  { %p3867_p1 = scmp.lt.u32.totalorder %s3863_s25, %s4293_s6 }
   0x5   :  { %p3869_p2 = pnand %p3867_p1, %p3864_p0 }
   0x7   :  { %3872 = shalt.err (!%p3869_p2)
}
   0x8   :  { %s3873_s30 = scalar_lea.vmem %s47_s22, 8192  ;;  %p3878_p4 = scmp.lt.s32.totalorder %s47_s22, %s47_s22 }
   0x9   :  { %p3874_p3 = scmp.ne.s32.totalorder %s47_s22, %s3873_s30  ;;  %p3879_p5 = scmp.lt.s32.totalorder %s3873_s30, %s3873_s30 }
   0xb   :  { %p3880_p6 = por %p3879_p5, %p3878_p4 }
   0xd   :  { %p3881_p7 = pnand %p3880_p6, %p3874_p3 }
   0xf   :  { %3884 = shalt.err (!%p3881_p7)
}
  0x10   :  { %s3934_s13 = smov 256   ;;  %s3935_s14 = smov 16  }
  0x11   :  { %52 = dma.hbm_to_vmem [thread:$0]  %s4293_s6, 8192, %s47_s22, [#allocation5], %s3934_s13, %s3934_s13, %s3935_s14  }
  0x12   :  { %s3936_s17 = smov [#allocation2]   ;;  %s3885_s21 = scalar_lea.hbm %s4290_s3, 2048 }
  0x13   :  { %s30_s18 = sshll.u32 %s3936_s17, 4  ;;  %p3886_p8 = scmp.ne.s32.totalorder %s4290_s3, %s3885_s21  ;;  %s31_s18 = int_to_ptr.vmem [resolvable:$true] %s30_s18 }
  0x14   :  { %p3889_p9 = scmp.lt.u32.totalorder %s3885_s21, %s4290_s3 }
  0x16   :  { %p3891_p10 = pnand %p3889_p9, %p3886_p8 }
  0x18   :  { %3894 = shalt.err (!%p3891_p10)
}
  0x19   :  { %s3895_s27 = scalar_lea.vmem %s31_s18, 2048  ;;  %p3900_p12 = scmp.lt.s32.totalorder %s31_s18, %s31_s18 }
  0x1a   :  { %p3896_p11 = scmp.ne.s32.totalorder %s31_s18, %s3895_s27  ;;  %p3901_p13 = scmp.lt.s32.totalorder %s3895_s27, %s3895_s27 }
  0x1c   :  { %p3902_p0 = por %p3901_p13, %p3900_p12 }
  0x1e   :  { %p3903_p1 = pnand %p3902_p0, %p3896_p11 }
  0x20   :  { %3906 = shalt.err (!%p3903_p1)
}
  0x21   :  { %s3937_s6 = smov 128   ;;  %s3938_s22 = smov 8  }
  0x22   :  { %36 = dma.hbm_to_vmem [thread:$0]  %s4290_s3, 2048, %s31_s18, [#allocation3], %s3937_s6, %s3937_s6, %s3938_s22  }
  0x23   :  { %s3939_s30 = smov [#allocation6]   ;;  %s3907_s16 = scalar_lea.hbm %s4296_s9, 32768 }
  0x24   :  { %s62_s13 = sshll.u32 %s3939_s30, 4  ;;  %p3908_p2 = scmp.ne.s32.totalorder %s4296_s9, %s3907_s16  ;;  %s63_s13 = int_to_ptr.vmem [resolvable:$true] %s62_s13 }
  0x25   :  { %p3911_p3 = scmp.lt.u32.totalorder %s3907_s16, %s4296_s9 }
  0x27   :  { %p3913_p4 = pnand %p3911_p3, %p3908_p2 }
  0x29   :  { %3916 = shalt.err (!%p3913_p4)
}
  0x2a   :  { %s3917_s23 = scalar_lea.vmem %s63_s13, 32768  ;;  %p3922_p6 = scmp.lt.s32.totalorder %s63_s13, %s63_s13 }
  0x2b   :  { %p3918_p5 = scmp.ne.s32.totalorder %s63_s13, %s3917_s23  ;;  %p3923_p7 = scmp.lt.s32.totalorder %s3917_s23, %s3917_s23 }
  0x2d   :  { %p3924_p8 = por %p3923_p7, %p3922_p6 }
  0x2f   :  { %p3925_p9 = pnand %p3924_p8, %p3918_p5 }
  0x31   :  { %3928 = shalt.err (!%p3925_p9)
}
  0x32   :  { %s3940_s3 = smov 512   ;;  %s3941_s18 = smov 32  }
  0x33   :  { %68 = dma.hbm_to_vmem [thread:$0]  %s4296_s9, 32768, %s63_s13, [#allocation5], %s3940_s3, %s3940_s3, %s3941_s18  }
  0x34   :  { %3929 = dma.done.wait [#allocation3], 2048  }
  0x35   :  { %3930 = vsyncadd [#allocation3], 4294965248 }
  0x36   :  { %3931 = dma.done.wait [#allocation5], 40960  }
  0x37   :  { %3932 = vsyncadd [#allocation5], 4294926336  ;;  %v3942_v0 = vmov 0.0   ;;  %vm3943_vm0 = vmmov 0   ;;  %v3707_v1 = vld [vmem:[%s4288_s1] sm:$0xff]   ;;  %v3708_v2 = vld [vmem:[%s4288_s1 + $0x8] sm:$0xff]  }
  0x38   :  { %3658 = vmatprep.subr.bf16.mxu0 %v3942_v0  ;;  %3674 = vmatprep.mubr.msk.bf16.mxu0 %vm3943_vm0, %v3942_v0  ;;  %v3709_v3 = vld [vmem:[%s4288_s1 + $0x10] sm:$0xff]   ;;  %v3715_v4 = vld [vmem:[#allocation2 + $0x4] ss:$8 sps:$4 sm:$0xff]   ;;  %v3717_v5 = vld [vmem:[#allocation2] ss:$8 sps:$4 sm:$0xff]   ;;  %v3944_v26 = vmov 0  }
  0x39   :  { %3659 = vmatpush3.bf16.msra.mxu0 %v3707_v1  ;;  %v3710_v6 = vld [vmem:[%s4288_s1 + $0x18] sm:$0xff]   ;;  %295 = vmatprep.subr.bf16.mxu1 %v3715_v4  ;;  %v3721_v9 = vld [vmem:[#allocation2 + $0x24] ss:$8 sps:$4 sm:$0xff]   ;;  %v3723_v12 = vld [vmem:[#allocation2 + $0x20] ss:$8 sps:$4 sm:$0xff]  }
  0x3a   :  { %3660 = vmatprep.subr.bf16.mxu0 %v3942_v0  ;;  %v3718_v7 = vld [vmem:[#allocation2 + $0x14] ss:$8 sps:$4 sm:$0xff]   ;;  %296 = vmatpush1.bf16.msra.mxu1 %v3717_v5  ;;  %v3720_v8 = vld [vmem:[#allocation2 + $0x10] ss:$8 sps:$4 sm:$0xff]   ;;  %v3711_v10 = vld [vmem:[%s4288_s1 + $0x20] sm:$0xff]  }
  0x3b   :  { %297 = vmatprep.subr.bf16.mxu1 %v3718_v7  ;;  %v3712_v11 = vld [vmem:[%s4288_s1 + $0x28] sm:$0xff]   ;;  %v3724_v13 = vld [vmem:[#allocation2 + $0x34] ss:$8 sps:$4 sm:$0xff]   ;;  %v3726_v14 = vld [vmem:[#allocation2 + $0x30] ss:$8 sps:$4 sm:$0xff]   ;;  %327 = vmatprep.mubr.bf16.mxu1 %v3944_v26 }
  0x3c   :  { %v3727_v15 = vld [vmem:[#allocation2 + $0x44] ss:$8 sps:$4 sm:$0xff]   ;;  %v3713_v16 = vld [vmem:[%s4288_s1 + $0x30] sm:$0xff]   ;;  %v3729_v17 = vld [vmem:[#allocation2 + $0x40] ss:$8 sps:$4 sm:$0xff]  }
  0x3d   :  { %3661 = vmatpush3.bf16.msra.mxu0 %v3708_v2  ;;  %v3730_v18 = vld [vmem:[#allocation2 + $0x54] ss:$8 sps:$4 sm:$0xff]   ;;  %v3732_v20 = vld [vmem:[#allocation2 + $0x50] ss:$8 sps:$4 sm:$0xff]   ;;  %v83_v21 = vld [vmem:[%s4287_s0] sm:$0xf] }
  0x3e   :  { %3662 = vmatprep.subr.bf16.mxu0 %v3942_v0  ;;  %298 = vmatpush1.bf16.msra.mxu1 %v3720_v8  ;;  %v3714_v19 = vld [vmem:[%s4288_s1 + $0x38] sm:$0xff]   ;;  %v3733_v22 = vld [vmem:[#allocation2 + $0x64] ss:$8 sps:$4 sm:$0xff]   ;;  %v3735_v23 = vld [vmem:[#allocation2 + $0x60] ss:$8 sps:$4 sm:$0xff]  }
  0x3f   :  { %299 = vmatprep.subr.bf16.mxu1 %v3721_v9  ;;  %v3736_v24 = vld [vmem:[#allocation2 + $0x74] ss:$8 sps:$4 sm:$0xff]   ;;  %v3738_v25 = vld [vmem:[#allocation2 + $0x70] ss:$8 sps:$4 sm:$0xff]   ;;  %v3296_v27 = vld [vmem:[%s4289_s2] ss:$0 sm:$0xff] }
  0x40   :  { %v3741_v36 = vld [vmem:[#allocation4 + $0x4] ss:$16 sps:$4 sm:$0xff]   ;;  %v3744_v37 = vld [vmem:[#allocation4 + $0xc] ss:$16 sps:$4 sm:$0xff]   ;;  %v3739_v38 = vld [vmem:[#allocation4] ss:$16 sps:$4 sm:$0xff]  }
  0x41   :  { %3663 = vmatpush3.bf16.msra.mxu0 %v3709_v3  ;;  %v3742_v39 = vld [vmem:[#allocation4 + $0x8] ss:$16 sps:$4 sm:$0xff]   ;;  %v3747_v40 = vld [vmem:[#allocation4 + $0x24] ss:$16 sps:$4 sm:$0xff]   ;;  %v3750_v41 = vld [vmem:[#allocation4 + $0x2c] ss:$16 sps:$4 sm:$0xff]  }
  0x42   :  { %3664 = vmatprep.subr.bf16.mxu0 %v3942_v0  ;;  %300 = vmatpush1.bf16.msra.mxu1 %v3723_v12  ;;  %v3745_v42 = vld [vmem:[#allocation4 + $0x20] ss:$16 sps:$4 sm:$0xff]   ;;  %v3748_v43 = vld [vmem:[#allocation4 + $0x28] ss:$16 sps:$4 sm:$0xff]   ;;  %v3753_v44 = vld [vmem:[#allocation4 + $0x44] ss:$16 sps:$4 sm:$0xff]  }
  0x43   :  { %301 = vmatprep.subr.bf16.mxu1 %v3724_v13  ;;  %v3756_v45 = vld [vmem:[#allocation4 + $0x4c] ss:$16 sps:$4 sm:$0xff]   ;;  %v3751_v46 = vld [vmem:[#allocation4 + $0x40] ss:$16 sps:$4 sm:$0xff]   ;;  %v3754_v47 = vld [vmem:[#allocation4 + $0x48] ss:$16 sps:$4 sm:$0xff]  }
  0x44   :  { %v3759_v48 = vld [vmem:[#allocation4 + $0x64] ss:$16 sps:$4 sm:$0xff]   ;;  %v3762_v49 = vld [vmem:[#allocation4 + $0x6c] ss:$16 sps:$4 sm:$0xff]   ;;  %v3757_v50 = vld [vmem:[#allocation4 + $0x60] ss:$16 sps:$4 sm:$0xff]  }
  0x45   :  { %3665 = vmatpush3.bf16.msra.mxu0 %v3710_v6  ;;  %v3760_v51 = vld [vmem:[#allocation4 + $0x68] ss:$16 sps:$4 sm:$0xff]   ;;  %v3765_v52 = vld [vmem:[#allocation4 + $0x84] ss:$16 sps:$4 sm:$0xff]   ;;  %v3768_v53 = vld [vmem:[#allocation4 + $0x8c] ss:$16 sps:$4 sm:$0xff]  }
  0x46   :  { %3666 = vmatprep.subr.bf16.mxu0 %v3942_v0  ;;  %302 = vmatpush1.bf16.msra.mxu1 %v3726_v14  ;;  %v3763_v54 = vld [vmem:[#allocation4 + $0x80] ss:$16 sps:$4 sm:$0xff]   ;;  %v3766_v55 = vld [vmem:[#allocation4 + $0x88] ss:$16 sps:$4 sm:$0xff]   ;;  %v3771_v56 = vld [vmem:[#allocation4 + $0xa4] ss:$16 sps:$4 sm:$0xff]  }
  0x47   :  { %303 = vmatprep.subr.bf16.mxu1 %v3727_v15  ;;  %v3774_v57 = vld [vmem:[#allocation4 + $0xac] ss:$16 sps:$4 sm:$0xff]   ;;  %v3769_v58 = vld [vmem:[#allocation4 + $0xa0] ss:$16 sps:$4 sm:$0xff]   ;;  %v3772_v59 = vld [vmem:[#allocation4 + $0xa8] ss:$16 sps:$4 sm:$0xff]  }
  0x48   :  { %v3777_v60 = vld [vmem:[#allocation4 + $0xc4] ss:$16 sps:$4 sm:$0xff]   ;;  %v3780_v61 = vld [vmem:[#allocation4 + $0xcc] ss:$16 sps:$4 sm:$0xff]   ;;  %v3775_v62 = vld [vmem:[#allocation4 + $0xc0] ss:$16 sps:$4 sm:$0xff]  }
  0x49   :  { %3667 = vmatpush3.bf16.msra.mxu0 %v3711_v10  ;;  %v3778_v63 = vld [vmem:[#allocation4 + $0xc8] ss:$16 sps:$4 sm:$0xff]   ;;  %v3786_v1 = vld [vmem:[#allocation4 + $0xec] ss:$16 sps:$4 sm:$0xff]   ;;  %v3781_v2 = vld [vmem:[#allocation4 + $0xe0] ss:$16 sps:$4 sm:$0xff]  }
  0x4a   :  { %3668 = vmatprep.subr.bf16.mxu0 %v3942_v0  ;;  %304 = vmatpush1.bf16.msra.mxu1 %v3729_v17  ;;  %v3784_v3 = vld [vmem:[#allocation4 + $0xe8] ss:$16 sps:$4 sm:$0xff]   ;;  %v3789_v4 = vld [vmem:[#allocation4 + $0x104] ss:$16 sps:$4 sm:$0xff]   ;;  %v3792_v5 = vld [vmem:[#allocation4 + $0x10c] ss:$16 sps:$4 sm:$0xff]  }
  0x4b   :  { %305 = vmatprep.subr.bf16.mxu1 %v3730_v18  ;;  %v3787_v6 = vld [vmem:[#allocation4 + $0x100] ss:$16 sps:$4 sm:$0xff]   ;;  %v3790_v7 = vld [vmem:[#allocation4 + $0x108] ss:$16 sps:$4 sm:$0xff]   ;;  %v3795_v8 = vld [vmem:[#allocation4 + $0x124] ss:$16 sps:$4 sm:$0xff]  }
  0x4c   :  { %v3798_v9 = vld [vmem:[#allocation4 + $0x12c] ss:$16 sps:$4 sm:$0xff]   ;;  %v3793_v10 = vld [vmem:[#allocation4 + $0x120] ss:$16 sps:$4 sm:$0xff]   ;;  %v3801_v12 = vld [vmem:[#allocation4 + $0x144] ss:$16 sps:$4 sm:$0xff]  }
  0x4d   :  { %3669 = vmatpush3.bf16.msra.mxu0 %v3712_v11  ;;  %v3796_v11 = vld [vmem:[#allocation4 + $0x128] ss:$16 sps:$4 sm:$0xff]   ;;  %v3804_v13 = vld [vmem:[#allocation4 + $0x14c] ss:$16 sps:$4 sm:$0xff]   ;;  %v3799_v14 = vld [vmem:[#allocation4 + $0x140] ss:$16 sps:$4 sm:$0xff]  }
  0x4e   :  { %3670 = vmatprep.subr.bf16.mxu0 %v3942_v0  ;;  %306 = vmatpush1.bf16.msra.mxu1 %v3732_v20  ;;  %v3802_v15 = vld [vmem:[#allocation4 + $0x148] ss:$16 sps:$4 sm:$0xff]   ;;  %v3810_v17 = vld [vmem:[#allocation4 + $0x16c] ss:$16 sps:$4 sm:$0xff]   ;;  %v3805_v18 = vld [vmem:[#allocation4 + $0x160] ss:$16 sps:$4 sm:$0xff]  }
  0x4f   :  { %307 = vmatprep.subr.bf16.mxu1 %v3733_v22  ;;  %v3813_v20 = vld [vmem:[#allocation4 + $0x184] ss:$16 sps:$4 sm:$0xff]   ;;  %v3811_v22 = vld [vmem:[#allocation4 + $0x180] ss:$16 sps:$4 sm:$0xff]  }
  0x50   :  { %v3817_v26 = vld [vmem:[#allocation4 + $0x1a0] ss:$16 sps:$4 sm:$0xff]  }
  0x51   :  { %3671 = vmatpush3.bf16.msra.mxu0 %v3713_v16  ;;  %v3807_v16 = vld [vmem:[#allocation4 + $0x164] ss:$16 sps:$4 sm:$0xff]  }
  0x52   :  { %3672 = vmatprep.subr.bf16.mxu0 %v3942_v0  ;;  %308 = vmatpush1.bf16.msra.mxu1 %v3735_v23  ;;  %v3783_v0 = vld [vmem:[#allocation4 + $0xe4] ss:$16 sps:$4 sm:$0xff]   ;;  %v3814_v23 = vld [vmem:[#allocation4 + $0x188] ss:$16 sps:$4 sm:$0xff]  }
  0x53   :  { %309 = vmatprep.subr.bf16.mxu1 %v3736_v24  ;;  %v3819_v24 = vld [vmem:[#allocation4 + $0x1a4] ss:$16 sps:$4 sm:$0xff]  }
  0x55   :  { %3673 = vmatpush3.bf16.msra.mxu0 %v3714_v19  ;;  %v3808_v19 = vld [vmem:[#allocation4 + $0x168] ss:$16 sps:$4 sm:$0xff]  }
  0x56   :  { %310 = vmatpush1.bf16.msra.mxu1 %v3738_v25  ;;  %811 = vmatprep.subr.bf16.mxu0 %v3741_v36  ;;  %v3822_v25 = vld [vmem:[#allocation4 + $0x1ac] ss:$16 sps:$4 sm:$0xff]  }
  0x57   :  { %852 = vmatprep.subr.bf16.mxu1 %v3744_v37 }
  0x58   :  { %3675 = vmatmul.mubr.bf16.vlgmr.msra.gmra.mrb[0].mxu0 %v83_v21  ;;  %v3816_v21 = vld [vmem:[#allocation4 + $0x18c] ss:$16 sps:$4 sm:$0xff]  }
  0x59   :  { %812 = vmatpush1.bf16.msra.mxu0 %v3739_v38 }
  0x5a   :  { %813 = vmatprep.subr.bf16.mxu0 %v3747_v40 }
  0x5d   :  { %814 = vmatpush1.bf16.msra.mxu0 %v3745_v42 }
  0x5e   :  { %815 = vmatprep.subr.bf16.mxu0 %v3753_v44 }
  0x61   :  { %816 = vmatpush1.bf16.msra.mxu0 %v3751_v46 }
  0x62   :  { %817 = vmatprep.subr.bf16.mxu0 %v3759_v48 }
  0x65   :  { %818 = vmatpush1.bf16.msra.mxu0 %v3757_v50 }
  0x66   :  { %819 = vmatprep.subr.bf16.mxu0 %v3765_v52 }
  0x69   :  { %820 = vmatpush1.bf16.msra.mxu0 %v3763_v54 }
  0x6a   :  { %821 = vmatprep.subr.bf16.mxu0 %v3771_v56 }
  0x6d   :  { %822 = vmatpush1.bf16.msra.mxu0 %v3769_v58 }
  0x6e   :  { %823 = vmatprep.subr.bf16.mxu0 %v3777_v60 }
  0x71   :  { %824 = vmatpush1.bf16.msra.mxu0 %v3775_v62 }
  0x72   :  { %825 = vmatprep.subr.bf16.mxu0 %v3783_v0 }
  0x75   :  { %826 = vmatpush1.bf16.msra.mxu0 %v3781_v2 }
  0x76   :  { %827 = vmatprep.subr.bf16.mxu0 %v3789_v4 }
  0x79   :  { %828 = vmatpush1.bf16.msra.mxu0 %v3787_v6 }
  0x7a   :  { %829 = vmatprep.subr.bf16.mxu0 %v3795_v8 }
  0x7d   :  { %830 = vmatpush1.bf16.msra.mxu0 %v3793_v10  ;;  %v3945_v10 = vmov 1966171168  }
  0x7e   :  { %831 = vmatprep.subr.bf16.mxu0 %v3801_v12  ;;  %v380_v12 = vlaneseq }
  0x81   :  { %832 = vmatpush1.bf16.msra.mxu0 %v3799_v14  ;;  %v4077_v14 = vshrl.u32 %v380_v12, 7  ;;  %v1100_v12 = vld [vmem:[#allocation6 + $0x128] sm:$0xff] }
  0x82   :  { %833 = vmatprep.subr.bf16.mxu0 %v3807_v16 }
  0x85   :  { %834 = vmatpush1.bf16.msra.mxu0 %v3805_v18 }
  0x86   :  { %835 = vmatprep.subr.bf16.mxu0 %v3813_v20  ;;  %v336_v20 = vld [vmem:[%s4291_s4] sm:$0x3] }
  0x89   :  { %836 = vmatpush1.bf16.msra.mxu0 %v3811_v22  ;;  %v4088_v22 = vsub.s32 0, %v4077_v14 }
  0x8a   :  { %837 = vmatprep.subr.bf16.mxu0 %v3819_v24  ;;  %v337_v24 = vld [vmem:[%s4292_s5] sm:$0x3] }
  0x8d   :  { %838 = vmatpush1.bf16.msra.mxu0 %v3817_v26 }
 0x12b   :  { %v189_v28 = vpop.f32.mrb[0].mxu0 }
 0x12c   :  { %v190_v29 = vadd.f32 %v3296_v27, %v189_v28  ;;  %v3676_v30 = vpop.f32.mrb[1].mxu0  ;;  %v3820_v27 = vld [vmem:[#allocation4 + $0x1a8] ss:$16 sps:$4 sm:$0xff]   ;;  %v3825_v28 = vld [vmem:[#allocation4 + $0x1c4] ss:$16 sps:$4 sm:$0xff]  }
 0x12d   :  { %v192_v31 = vpop.f32.mrb[2].mxu0  ;;  %v3823_v30 = vld [vmem:[#allocation4 + $0x1c0] ss:$16 sps:$4 sm:$0xff]   ;;  %839 = vmatprep.subr.bf16.mxu0 %v3825_v28  ;;  %v410_v28 = vrot.slane %v337_v24, %v4088_v22 }
 0x12e   :  { %vm195_vm1 = vcmp.gt.f32.partialorder %v190_v29, 0.0  ;;  %v196_v32 = vmul.f32 0.2, %v190_v29  ;;  %v3677_v33 = vpop.f32.mrb[3].mxu0  ;;  %v3826_v31 = vld [vmem:[#allocation4 + $0x1c8] ss:$16 sps:$4 sm:$0xff]   ;;  %840 = vmatpush1.bf16.msra.mxu0 %v3823_v30 }
 0x12f   :  { %v3829_v33 = vld [vmem:[#allocation4 + $0x1e0] ss:$16 sps:$4 sm:$0xff]  }
 0x130   :  { %v197_v34 = vsel %vm195_vm1, %v190_v29, %v196_v32  ;;  %v3828_v29 = vld [vmem:[#allocation4 + $0x1cc] ss:$16 sps:$4 sm:$0xff]   ;;  %v3831_v32 = vld [vmem:[#allocation4 + $0x1e4] ss:$16 sps:$4 sm:$0xff]  }
 0x131   :  { %v198_v35 = vpack.c.bf16 %v197_v34, %v197_v34  ;;  %v3832_v34 = vld [vmem:[#allocation4 + $0x1e8] ss:$16 sps:$4 sm:$0xff]   ;;  %841 = vmatprep.subr.bf16.mxu0 %v3831_v32 }
 0x132   :  { %842 = vmatpush1.bf16.msra.mxu0 %v3829_v33 }
 0x133   :  { %328 = vmatmul.mubr.bf16.vlgmr.msra.gmra.mrb[0].mxu1 %v198_v35  ;;  %v3834_v35 = vld [vmem:[#allocation4 + $0x1ec] ss:$16 sps:$4 sm:$0xff]  }
 0x134   :  { %853 = vmatpush1.bf16.msra.mxu1 %v3742_v39 }
 0x135   :  { %854 = vmatprep.subr.bf16.mxu1 %v3750_v41 }
 0x138   :  { %855 = vmatpush1.bf16.msra.mxu1 %v3748_v43 }
 0x139   :  { %856 = vmatprep.subr.bf16.mxu1 %v3756_v45 }
 0x13c   :  { %857 = vmatpush1.bf16.msra.mxu1 %v3754_v47 }
 0x13d   :  { %858 = vmatprep.subr.bf16.mxu1 %v3762_v49 }
 0x140   :  { %859 = vmatpush1.bf16.msra.mxu1 %v3760_v51 }
 0x141   :  { %860 = vmatprep.subr.bf16.mxu1 %v3768_v53 }
 0x144   :  { %861 = vmatpush1.bf16.msra.mxu1 %v3766_v55 }
 0x145   :  { %862 = vmatprep.subr.bf16.mxu1 %v3774_v57 }
 0x148   :  { %863 = vmatpush1.bf16.msra.mxu1 %v3772_v59 }
 0x149   :  { %864 = vmatprep.subr.bf16.mxu1 %v3780_v61 }
 0x14c   :  { %865 = vmatpush1.bf16.msra.mxu1 %v3778_v63 }
 0x14d   :  { %866 = vmatprep.subr.bf16.mxu1 %v3786_v1 }
 0x150   :  { %867 = vmatpush1.bf16.msra.mxu1 %v3784_v3 }
 0x151   :  { %868 = vmatprep.subr.bf16.mxu1 %v3792_v5 }
 0x154   :  { %869 = vmatpush1.bf16.msra.mxu1 %v3790_v7 }
 0x155   :  { %870 = vmatprep.subr.bf16.mxu1 %v3798_v9 }
 0x158   :  { %871 = vmatpush1.bf16.msra.mxu1 %v3796_v11  ;;  %v378_v11 = vunpack.c.l.s4 %v3945_v10  ;;  %v1096_v10 = vld [vmem:[#allocation6 + $0x108] sm:$0xff] }
 0x159   :  { %872 = vmatprep.subr.bf16.mxu1 %v3804_v13 }
 0x15a   :  { %v379_v13 = vunpack.c.0.s8 %v378_v11 }
 0x15c   :  { %873 = vmatpush1.bf16.msra.mxu1 %v3802_v15  ;;  %v4080_v16 = vsub.s32 %v379_v13, %v4077_v14 }
 0x15d   :  { %874 = vmatprep.subr.bf16.mxu1 %v3810_v17 }
 0x160   :  { %875 = vmatpush1.bf16.msra.mxu1 %v3808_v19 }
 0x161   :  { %876 = vmatprep.subr.bf16.mxu1 %v3816_v21 }
 0x164   :  { %877 = vmatpush1.bf16.msra.mxu1 %v3814_v23  ;;  %v4091_v23 = vsub.s32 1, %v4077_v14 }
 0x165   :  { %878 = vmatprep.subr.bf16.mxu1 %v3822_v25 }
 0x168   :  { %879 = vmatpush1.bf16.msra.mxu1 %v3820_v27 }
 0x169   :  { %880 = vmatprep.subr.bf16.mxu1 %v3828_v29  ;;  %v414_v29 = vrot.slane %v337_v24, %v4091_v23  ;;  %v1108_v24 = vld [vmem:[#allocation6 + $0x168] sm:$0xff] }
 0x16c   :  { %881 = vmatpush1.bf16.msra.mxu1 %v3826_v31 }
 0x16d   :  { %882 = vmatprep.subr.bf16.mxu1 %v3834_v35 }
 0x170   :  { %883 = vmatpush1.bf16.msra.mxu1 %v3832_v34 }
 0x206   :  { %v329_v36 = vpop.f32.mrb[0].mxu1 }
 0x207   :  { %v338_v37 = vrot.slane %v329_v36, 4  ;;  %v331_v38 = vpop.f32.mrb[1].mxu1 }
 0x208   :  { %v344_v39 = vrot.slane %v331_v38, 4  ;;  %v333_v40 = vpop.f32.mrb[2].mxu1 }
 0x209   :  { %v339_v41 = vadd.f32 %v338_v37, %v329_v36  ;;  %v334_v42 = vpop.f32.mrb[3].mxu1  ;;  %v1063_v40 = vld [vmem:[#allocation6] sm:$0xff] }
 0x20a   :  { %v345_v43 = vadd.f32 %v344_v39, %v331_v38  ;;  %v1064_v42 = vld [vmem:[#allocation6 + $0x8] sm:$0xff] }
 0x20b   :  { %v340_v44 = vrot.slane %v339_v41, 2 }
 0x20c   :  { %v346_v45 = vrot.slane %v345_v43, 2 }
 0x20d   :  { %v341_v46 = vadd.f32 %v340_v44, %v339_v41  ;;  %v1067_v41 = vld [vmem:[#allocation6 + $0x20] sm:$0xff]  ;;  %v1068_v44 = vld [vmem:[#allocation6 + $0x28] sm:$0xff] }
 0x20e   :  { %v347_v47 = vadd.f32 %v346_v45, %v345_v43  ;;  %v3386_v43 = vcombine.high %v1063_v40, %v1067_v41  ;;  %v3385_v45 = vcombine.low %v1063_v40, %v1067_v41  ;;  %v1124_v40 = vld [vmem:[#allocation6 + $0x1e8] sm:$0xff] }
 0x20f   :  { %v342_v48 = vrot.slane %v341_v46, 1 }
 0x210   :  { %v348_v49 = vrot.slane %v347_v47, 1  ;;  %2599 = vmatprep.subr.bf16.mxu0 %v3386_v43 }
 0x211   :  { %v343_v50 = vadd.f32 %v342_v48, %v341_v46  ;;  %v3387_v46 = vcombine.low %v1064_v42, %v1068_v44  ;;  %v1071_v48 = vld [vmem:[#allocation6 + $0x40] sm:$0xff] }
 0x212   :  { %v349_v51 = vadd.f32 %v348_v49, %v347_v47  ;;  %v3388_v47 = vcombine.high %v1064_v42, %v1068_v44  ;;  %v1075_v49 = vld [vmem:[#allocation6 + $0x60] sm:$0xff] }
 0x213   :  { %v350_v52 = vmul.f32 0.125, %v343_v50  ;;  %v1072_v50 = vld [vmem:[#allocation6 + $0x48] sm:$0xff]  ;;  %v1127_v44 = vld [vmem:[#allocation6 + $0x200] sm:$0xff] }
 0x214   :  { %v351_v53 = vmul.f32 0.125, %v349_v51  ;;  %2681 = vmatprep.subr.bf16.mxu1 %v3388_v47  ;;  %v3394_v51 = vcombine.high %v1071_v48, %v1075_v49 }
 0x215   :  { %v352_v54 = vsub.f32 %v329_v36, %v350_v52  ;;  %v1076_v52 = vld [vmem:[#allocation6 + $0x68] sm:$0xff] }
 0x216   :  { %v353_v55 = vsub.f32 %v331_v38, %v351_v53  ;;  %v3393_v53 = vcombine.low %v1071_v48, %v1075_v49  ;;  %v1132_v48 = vld [vmem:[#allocation6 + $0x228] sm:$0xff] }
 0x217   :  { %v354_v56 = vmul.f32 %v352_v54, %v352_v54 }
 0x218   :  { %v355_v57 = vmul.f32 %v353_v55, %v353_v55 }
 0x219   :  { %v356_v58 = vrot.slane %v354_v56, 4 }
 0x21a   :  { %v362_v59 = vrot.slane %v355_v57, 4 }
 0x21b   :  { %v357_v60 = vadd.f32 %v356_v58, %v354_v56  ;;  %v1079_v56 = vld [vmem:[#allocation6 + $0x80] sm:$0xff]  ;;  %v1080_v58 = vld [vmem:[#allocation6 + $0x88] sm:$0xff] }
 0x21c   :  { %v363_v61 = vadd.f32 %v362_v59, %v355_v57  ;;  %v1083_v57 = vld [vmem:[#allocation6 + $0xa0] sm:$0xff] }
 0x21d   :  { %v358_v62 = vrot.slane %v357_v60, 2  ;;  %v3402_v59 = vcombine.high %v1079_v56, %v1083_v57 }
 0x21e   :  { %v364_v63 = vrot.slane %v363_v61, 2 }
 0x21f   :  { %v359_v0 = vadd.f32 %v358_v62, %v357_v60  ;;  %v1084_v60 = vld [vmem:[#allocation6 + $0xa8] sm:$0xff] }
 0x220   :  { %v365_v1 = vadd.f32 %v364_v63, %v363_v61  ;;  %v3401_v61 = vcombine.low %v1079_v56, %v1083_v57  ;;  %v3403_v62 = vcombine.low %v1080_v58, %v1084_v60  ;;  %v3404_v63 = vcombine.high %v1080_v58, %v1084_v60  ;;  %v1140_v56 = vld [vmem:[#allocation6 + $0x268] sm:$0xff]  ;;  %v1143_v60 = vld [vmem:[#allocation6 + $0x280] sm:$0xff] }
 0x221   :  { %v360_v2 = vrot.slane %v359_v0, 1 }
 0x222   :  { %v366_v3 = vrot.slane %v365_v1, 1 }
 0x223   :  { %v361_v4 = vadd.f32 %v360_v2, %v359_v0  ;;  %v1087_v0 = vld [vmem:[#allocation6 + $0xc0] sm:$0xff]  ;;  %v1088_v2 = vld [vmem:[#allocation6 + $0xc8] sm:$0xff] }
 0x224   :  { %v367_v5 = vadd.f32 %v366_v3, %v365_v1  ;;  %v1091_v1 = vld [vmem:[#allocation6 + $0xe0] sm:$0xff] }
 0x225   :  { %v368_v6 = vmul.f32 0.125, %v361_v4  ;;  %v3410_v3 = vcombine.high %v1087_v0, %v1091_v1  ;;  %v1092_v4 = vld [vmem:[#allocation6 + $0xe8] sm:$0xff] }
 0x226   :  { %v369_v7 = vmul.f32 0.125, %v367_v5  ;;  %v3409_v5 = vcombine.low %v1087_v0, %v1091_v1  ;;  %v1148_v0 = vld [vmem:[#allocation6 + $0x2a8] sm:$0xff] }
 0x227   :  { %v370_v8 = vadd.f32 1e-05, %v368_v6  ;;  %v3411_v6 = vcombine.low %v1088_v2, %v1092_v4 }
 0x228   :  { %v371_v9 = vadd.f32 1e-05, %v369_v7  ;;  %v3412_v7 = vcombine.high %v1088_v2, %v1092_v4  ;;  %v1151_v4 = vld [vmem:[#allocation6 + $0x2c0] sm:$0xff] }
 0x229   :  { %3835 = vrsqrt.f32 %v370_v8  ;;  %v1095_v8 = vld [vmem:[#allocation6 + $0x100] sm:$0xff] }
 0x22a   :  { %3837 = vrsqrt.f32 %v371_v9  ;;  %v1099_v9 = vld [vmem:[#allocation6 + $0x120] sm:$0xff] }
 0x22b   :  { %v3418_v11 = vcombine.high %v1095_v8, %v1099_v9  ;;  %v3417_v13 = vcombine.low %v1095_v8, %v1099_v9  ;;  %v1156_v8 = vld [vmem:[#allocation6 + $0x2e8] sm:$0xff] }
 0x233   :  { %v3836_v15 = vpop.eup %3835 }
 0x234   :  { %v3838_v17 = vpop.eup %3837 }
 0x235   :  { %v376_v18 = vcombine.low %v3836_v15, %v3838_v17  ;;  %v3419_v15 = vcombine.low %v1096_v10, %v1100_v12  ;;  %v3420_v17 = vcombine.high %v1096_v10, %v1100_v12  ;;  %v1159_v12 = vld [vmem:[#allocation6 + $0x300] sm:$0xff] }
 0x237   :  { %v383_v19 = vrot.slane %v376_v18, %v4080_v16  ;;  %v1103_v18 = vld [vmem:[#allocation6 + $0x140] sm:$0xff] }
 0x239   :  { %v390_v21 = vrot.slane %v383_v19, %v4080_v16  ;;  %v1107_v19 = vld [vmem:[#allocation6 + $0x160] sm:$0xff] }
 0x23b   :  { %v392_v25 = vmul.f32 %v390_v21, %v336_v20  ;;  %v1104_v20 = vld [vmem:[#allocation6 + $0x148] sm:$0xff]  ;;  %v3426_v21 = vcombine.high %v1103_v18, %v1107_v19 }
 0x23d   :  { %v397_v26 = vrot.slane %v392_v25, %v4088_v22  ;;  %v401_v27 = vrot.slane %v392_v25, %v4091_v23  ;;  %v3425_v25 = vcombine.low %v1103_v18, %v1107_v19  ;;  %v1164_v18 = vld [vmem:[#allocation6 + $0x328] sm:$0xff] }
 0x23f   :  { %v404_v30 = vmul.f32 %v397_v26, %v352_v54  ;;  %v405_v31 = vmul.f32 %v401_v27, %v353_v55  ;;  %v3395_v54 = vcombine.low %v1072_v50, %v1076_v52  ;;  %v3396_v55 = vcombine.high %v1072_v50, %v1076_v52  ;;  %v1135_v52 = vld [vmem:[#allocation6 + $0x240] sm:$0xff] }
 0x240   :  { %v3427_v26 = vcombine.low %v1104_v20, %v1108_v24  ;;  %v3428_v27 = vcombine.high %v1104_v20, %v1108_v24  ;;  %v1167_v24 = vld [vmem:[#allocation6 + $0x340] sm:$0xff] }
 0x241   :  { %v418_v32 = vadd.f32 %v414_v29, %v405_v31  ;;  %v417_v33 = vadd.f32 %v410_v28, %v404_v30  ;;  %v1111_v28 = vld [vmem:[#allocation6 + $0x180] sm:$0xff]  ;;  %v1112_v30 = vld [vmem:[#allocation6 + $0x188] sm:$0xff] }
 0x242   :  { %v1115_v29 = vld [vmem:[#allocation6 + $0x1a0] sm:$0xff] }
 0x243   :  { %vm420_vm2 = vcmp.gt.f32.partialorder %v418_v32, 0.0  ;;  %v422_v34 = vmul.f32 0.2, %v418_v32  ;;  %vm419_vm3 = vcmp.gt.f32.partialorder %v417_v33, 0.0  ;;  %v421_v35 = vmul.f32 0.2, %v417_v33 }
 0x244   :  { %v3434_v31 = vcombine.high %v1111_v28, %v1115_v29 }
 0x245   :  { %v424_v36 = vsel %vm420_vm2, %v418_v32, %v422_v34  ;;  %v423_v37 = vsel %vm419_vm3, %v417_v33, %v421_v35  ;;  %v1116_v32 = vld [vmem:[#allocation6 + $0x1a8] sm:$0xff]  ;;  %v3433_v33 = vcombine.low %v1111_v28, %v1115_v29 }
 0x246   :  { %v426_v38 = vpack.c.bf16 %v424_v36, %v424_v36  ;;  %v425_v39 = vpack.c.bf16 %v423_v37, %v423_v37  ;;  %v3435_v34 = vcombine.low %v1112_v30, %v1116_v32  ;;  %v3436_v35 = vcombine.high %v1112_v30, %v1116_v32  ;;  %v1119_v36 = vld [vmem:[#allocation6 + $0x1c0] sm:$0xff]  ;;  %v1172_v28 = vld [vmem:[#allocation6 + $0x368] sm:$0xff] }
 0x247   :  { %v1123_v37 = vld [vmem:[#allocation6 + $0x1e0] sm:$0xff] }
 0x248   :  { %843 = vmatprep.mubr.bf16.mxu0 %v426_v38  ;;  %884 = vmatprep.mubr.bf16.mxu1 %v426_v38  ;;  %v1120_v38 = vld [vmem:[#allocation6 + $0x1c8] sm:$0xff]  ;;  %v3441_v41 = vcombine.low %v1119_v36, %v1123_v37  ;;  %v1175_v32 = vld [vmem:[#allocation6 + $0x380] sm:$0xff] }
 0x249   :  { %844 = vmatmul.mubr.bf16.vlgmr.msra.gmra.mrb[4].mxu0 %v425_v39  ;;  %885 = vmatmul.mubr.bf16.vlgmr.msra.gmra.mrb[4].mxu1 %v425_v39  ;;  %v3442_v39 = vcombine.high %v1119_v36, %v1123_v37  ;;  %v3443_v42 = vcombine.low %v1120_v38, %v1124_v40  ;;  %v3444_v43 = vcombine.high %v1120_v38, %v1124_v40  ;;  %v1180_v36 = vld [vmem:[#allocation6 + $0x3a8] sm:$0xff]  ;;  %v1183_v40 = vld [vmem:[#allocation6 + $0x3c0] sm:$0xff] }
 0x24a   :  { %2600 = vmatpush1.bf16.msra.mxu0 %v3385_v45  ;;  %2682 = vmatpush1.bf16.msra.mxu1 %v3387_v46  ;;  %v1131_v45 = vld [vmem:[#allocation6 + $0x220] sm:$0xff]  ;;  %v1128_v46 = vld [vmem:[#allocation6 + $0x208] sm:$0xff] }
 0x24b   :  { %2601 = vmatprep.subr.bf16.mxu0 %v3394_v51  ;;  %2683 = vmatprep.subr.bf16.mxu1 %v3396_v55  ;;  %v3450_v47 = vcombine.high %v1127_v44, %v1131_v45  ;;  %v3449_v49 = vcombine.low %v1127_v44, %v1131_v45  ;;  %v3451_v50 = vcombine.low %v1128_v46, %v1132_v48  ;;  %v1188_v44 = vld [vmem:[#allocation6 + $0x3e8] sm:$0xff] }
 0x24c   :  { %v3452_v51 = vcombine.high %v1128_v46, %v1132_v48  ;;  %v4100_v48 = vld [vmem:[#allocation6 + $0x400] sm:$0xff] }
 0x24e   :  { %2602 = vmatpush1.bf16.msra.mxu0 %v3393_v53  ;;  %2684 = vmatpush1.bf16.msra.mxu1 %v3395_v54  ;;  %v1139_v53 = vld [vmem:[#allocation6 + $0x260] sm:$0xff]  ;;  %v1136_v54 = vld [vmem:[#allocation6 + $0x248] sm:$0xff] }
 0x24f   :  { %2603 = vmatprep.subr.bf16.mxu0 %v3402_v59  ;;  %2685 = vmatprep.subr.bf16.mxu1 %v3404_v63  ;;  %v3458_v55 = vcombine.high %v1135_v52, %v1139_v53  ;;  %v3457_v57 = vcombine.low %v1135_v52, %v1139_v53  ;;  %v3459_v58 = vcombine.low %v1136_v54, %v1140_v56  ;;  %v4108_v52 = vld [vmem:[#allocation6 + $0x428] sm:$0xff] }
 0x250   :  { %v3460_v59 = vcombine.high %v1136_v54, %v1140_v56 }
 0x252   :  { %2604 = vmatpush1.bf16.msra.mxu0 %v3401_v61  ;;  %2686 = vmatpush1.bf16.msra.mxu1 %v3403_v62  ;;  %v1147_v61 = vld [vmem:[#allocation6 + $0x2a0] sm:$0xff]  ;;  %v1144_v62 = vld [vmem:[#allocation6 + $0x288] sm:$0xff] }
 0x253   :  { %2605 = vmatprep.subr.bf16.mxu0 %v3410_v3  ;;  %2687 = vmatprep.subr.bf16.mxu1 %v3412_v7  ;;  %v3466_v63 = vcombine.high %v1143_v60, %v1147_v61  ;;  %v3465_v1 = vcombine.low %v1143_v60, %v1147_v61  ;;  %v3467_v2 = vcombine.low %v1144_v62, %v1148_v0 }
 0x254   :  { %v3468_v3 = vcombine.high %v1144_v62, %v1148_v0 }
 0x256   :  { %2606 = vmatpush1.bf16.msra.mxu0 %v3409_v5  ;;  %2688 = vmatpush1.bf16.msra.mxu1 %v3411_v6  ;;  %v1155_v5 = vld [vmem:[#allocation6 + $0x2e0] sm:$0xff]  ;;  %v1152_v6 = vld [vmem:[#allocation6 + $0x2c8] sm:$0xff] }
 0x257   :  { %2607 = vmatprep.subr.bf16.mxu0 %v3418_v11  ;;  %2689 = vmatprep.subr.bf16.mxu1 %v3420_v17  ;;  %v3474_v7 = vcombine.high %v1151_v4, %v1155_v5  ;;  %v3473_v9 = vcombine.low %v1151_v4, %v1155_v5  ;;  %v3475_v10 = vcombine.low %v1152_v6, %v1156_v8 }
 0x258   :  { %v3476_v11 = vcombine.high %v1152_v6, %v1156_v8 }
 0x25a   :  { %2608 = vmatpush1.bf16.msra.mxu0 %v3417_v13  ;;  %2690 = vmatpush1.bf16.msra.mxu1 %v3419_v15  ;;  %v1163_v13 = vld [vmem:[#allocation6 + $0x320] sm:$0xff]  ;;  %v1160_v15 = vld [vmem:[#allocation6 + $0x308] sm:$0xff] }
 0x25b   :  { %2609 = vmatprep.subr.bf16.mxu0 %v3426_v21  ;;  %2691 = vmatprep.subr.bf16.mxu1 %v3428_v27  ;;  %v3482_v17 = vcombine.high %v1159_v12, %v1163_v13  ;;  %v3481_v19 = vcombine.low %v1159_v12, %v1163_v13  ;;  %v3483_v20 = vcombine.low %v1160_v15, %v1164_v18 }
 0x25c   :  { %v3484_v21 = vcombine.high %v1160_v15, %v1164_v18 }
 0x25e   :  { %2610 = vmatpush1.bf16.msra.mxu0 %v3425_v25  ;;  %2692 = vmatpush1.bf16.msra.mxu1 %v3427_v26  ;;  %v1171_v25 = vld [vmem:[#allocation6 + $0x360] sm:$0xff]  ;;  %v1168_v26 = vld [vmem:[#allocation6 + $0x348] sm:$0xff] }
 0x25f   :  { %2611 = vmatprep.subr.bf16.mxu0 %v3434_v31  ;;  %2693 = vmatprep.subr.bf16.mxu1 %v3436_v35  ;;  %v3490_v27 = vcombine.high %v1167_v24, %v1171_v25  ;;  %v3489_v29 = vcombine.low %v1167_v24, %v1171_v25  ;;  %v3491_v30 = vcombine.low %v1168_v26, %v1172_v28 }
 0x260   :  { %v3492_v31 = vcombine.high %v1168_v26, %v1172_v28 }
 0x262   :  { %2612 = vmatpush1.bf16.msra.mxu0 %v3433_v33  ;;  %2694 = vmatpush1.bf16.msra.mxu1 %v3435_v34  ;;  %v1179_v33 = vld [vmem:[#allocation6 + $0x3a0] sm:$0xff]  ;;  %v1176_v34 = vld [vmem:[#allocation6 + $0x388] sm:$0xff] }
 0x263   :  { %2613 = vmatprep.subr.bf16.mxu0 %v3442_v39  ;;  %2695 = vmatprep.subr.bf16.mxu1 %v3444_v43  ;;  %v3498_v35 = vcombine.high %v1175_v32, %v1179_v33  ;;  %v3497_v37 = vcombine.low %v1175_v32, %v1179_v33  ;;  %v3499_v38 = vcombine.low %v1176_v34, %v1180_v36 }
 0x264   :  { %v3500_v39 = vcombine.high %v1176_v34, %v1180_v36 }
 0x266   :  { %2614 = vmatpush1.bf16.msra.mxu0 %v3441_v41  ;;  %2696 = vmatpush1.bf16.msra.mxu1 %v3443_v42  ;;  %v1187_v41 = vld [vmem:[#allocation6 + $0x3e0] sm:$0xff]  ;;  %v1184_v42 = vld [vmem:[#allocation6 + $0x3c8] sm:$0xff] }
 0x267   :  { %2615 = vmatprep.subr.bf16.mxu0 %v3450_v47  ;;  %2697 = vmatprep.subr.bf16.mxu1 %v3452_v51  ;;  %v3506_v43 = vcombine.high %v1183_v40, %v1187_v41  ;;  %v3505_v45 = vcombine.low %v1183_v40, %v1187_v41  ;;  %v3507_v46 = vcombine.low %v1184_v42, %v1188_v44 }
 0x268   :  { %v3508_v47 = vcombine.high %v1184_v42, %v1188_v44 }
 0x26a   :  { %2616 = vmatpush1.bf16.msra.mxu0 %v3449_v49  ;;  %2698 = vmatpush1.bf16.msra.mxu1 %v3451_v50  ;;  %v4102_v49 = vld [vmem:[#allocation6 + $0x420] sm:$0xff]  ;;  %v4104_v50 = vld [vmem:[#allocation6 + $0x408] sm:$0xff] }
 0x26b   :  { %2617 = vmatprep.subr.bf16.mxu0 %v3458_v55  ;;  %2699 = vmatprep.subr.bf16.mxu1 %v3460_v59  ;;  %v3514_v51 = vcombine.high %v4100_v48, %v4102_v49  ;;  %v3513_v53 = vcombine.low %v4100_v48, %v4102_v49  ;;  %v3515_v54 = vcombine.low %v4104_v50, %v4108_v52 }
 0x26c   :  { %v3516_v55 = vcombine.high %v4104_v50, %v4108_v52 }
 0x26e   :  { %2618 = vmatpush1.bf16.msra.mxu0 %v3457_v57  ;;  %2700 = vmatpush1.bf16.msra.mxu1 %v3459_v58 }
 0x26f   :  { %2619 = vmatprep.subr.bf16.mxu0 %v3466_v63  ;;  %2701 = vmatprep.subr.bf16.mxu1 %v3468_v3 }
 0x272   :  { %2620 = vmatpush1.bf16.msra.mxu0 %v3465_v1  ;;  %2702 = vmatpush1.bf16.msra.mxu1 %v3467_v2 }
 0x273   :  { %2621 = vmatprep.subr.bf16.mxu0 %v3474_v7  ;;  %2703 = vmatprep.subr.bf16.mxu1 %v3476_v11 }
 0x276   :  { %2622 = vmatpush1.bf16.msra.mxu0 %v3473_v9  ;;  %2704 = vmatpush1.bf16.msra.mxu1 %v3475_v10 }
 0x277   :  { %2623 = vmatprep.subr.bf16.mxu0 %v3482_v17  ;;  %2705 = vmatprep.subr.bf16.mxu1 %v3484_v21 }
 0x27a   :  { %2624 = vmatpush1.bf16.msra.mxu0 %v3481_v19  ;;  %2706 = vmatpush1.bf16.msra.mxu1 %v3483_v20 }
 0x27b   :  { %2625 = vmatprep.subr.bf16.mxu0 %v3490_v27  ;;  %2707 = vmatprep.subr.bf16.mxu1 %v3492_v31 }
 0x27e   :  { %2626 = vmatpush1.bf16.msra.mxu0 %v3489_v29  ;;  %2708 = vmatpush1.bf16.msra.mxu1 %v3491_v30 }
 0x27f   :  { %2627 = vmatprep.subr.bf16.mxu0 %v3498_v35  ;;  %2709 = vmatprep.subr.bf16.mxu1 %v3500_v39 }
 0x282   :  { %2628 = vmatpush1.bf16.msra.mxu0 %v3497_v37  ;;  %2710 = vmatpush1.bf16.msra.mxu1 %v3499_v38 }
 0x283   :  { %2629 = vmatprep.subr.bf16.mxu0 %v3506_v43  ;;  %2711 = vmatprep.subr.bf16.mxu1 %v3508_v47 }
 0x286   :  { %2630 = vmatpush1.bf16.msra.mxu0 %v3505_v45  ;;  %2712 = vmatpush1.bf16.msra.mxu1 %v3507_v46 }
 0x287   :  { %2640 = vmatprep.subr.bf16.mxu0 %v3514_v51  ;;  %2722 = vmatprep.subr.bf16.mxu1 %v3516_v55 }
 0x31c   :  { %v845_v56 = vpop.f32.mrb[4].mxu0  ;;  %v886_v57 = vpop.f32.mrb[4].mxu1 }
 0x31d   :  { %v895_v58 = vrot.slane %v845_v56, 4  ;;  %v907_v59 = vrot.slane %v886_v57, 4  ;;  %v847_v60 = vpop.f32.mrb[5].mxu0  ;;  %v888_v61 = vpop.f32.mrb[5].mxu1 }
 0x31e   :  { %v901_v62 = vrot.slane %v847_v60, 4  ;;  %v913_v63 = vrot.slane %v888_v61, 4  ;;  %v849_v0 = vpop.f32.mrb[6].mxu0  ;;  %v890_v1 = vpop.f32.mrb[6].mxu1 }
 0x31f   :  { %v896_v2 = vadd.f32 %v895_v58, %v845_v56  ;;  %v908_v3 = vadd.f32 %v907_v59, %v886_v57  ;;  %v850_v4 = vpop.f32.mrb[7].mxu0  ;;  %v891_v5 = vpop.f32.mrb[7].mxu1 }
 0x320   :  { %v902_v6 = vadd.f32 %v901_v62, %v847_v60  ;;  %v914_v7 = vadd.f32 %v913_v63, %v888_v61 }
 0x321   :  { %v897_v8 = vrot.slane %v896_v2, 2  ;;  %v909_v9 = vrot.slane %v908_v3, 2 }
 0x322   :  { %v903_v10 = vrot.slane %v902_v6, 2  ;;  %v915_v11 = vrot.slane %v914_v7, 2 }
 0x323   :  { %v898_v12 = vadd.f32 %v897_v8, %v896_v2  ;;  %v910_v13 = vadd.f32 %v909_v9, %v908_v3 }
 0x324   :  { %v904_v15 = vadd.f32 %v903_v10, %v902_v6  ;;  %v916_v17 = vadd.f32 %v915_v11, %v914_v7 }
 0x325   :  { %v899_v18 = vrot.slane %v898_v12, 1  ;;  %v911_v19 = vrot.slane %v910_v13, 1 }
 0x326   :  { %v905_v20 = vrot.slane %v904_v15, 1  ;;  %v917_v21 = vrot.slane %v916_v17, 1 }
 0x327   :  { %v900_v24 = vadd.f32 %v899_v18, %v898_v12  ;;  %v912_v25 = vadd.f32 %v911_v19, %v910_v13 }
 0x328   :  { %v906_v26 = vadd.f32 %v905_v20, %v904_v15  ;;  %v918_v27 = vadd.f32 %v917_v21, %v916_v17 }
 0x329   :  { %v919_v28 = vmul.f32 0.125, %v900_v24  ;;  %v921_v29 = vmul.f32 0.125, %v912_v25 }
 0x32a   :  { %v920_v30 = vmul.f32 0.125, %v906_v26  ;;  %v922_v31 = vmul.f32 0.125, %v918_v27  ;;  %v893_v27 = vld [vmem:[%s4294_s7] sm:$0xf] }
 0x32b   :  { %v4116_v32 = vsub.f32 %v845_v56, %v919_v28  ;;  %v4118_v33 = vsub.f32 %v886_v57, %v921_v29  ;;  %v894_v28 = vld [vmem:[%s4295_s8] sm:$0xf] }
 0x32c   :  { %v4120_v34 = vsub.f32 %v847_v60, %v920_v30  ;;  %v4122_v35 = vsub.f32 %v888_v61, %v922_v31  ;;  %v4142_v30 = vsub.s32 3, %v4077_v14  ;;  %v4145_v31 = vsub.s32 2, %v4077_v14 }
 0x32d   :  { %v927_v36 = vmul.f32 %v4116_v32, %v4116_v32  ;;  %v929_v37 = vmul.f32 %v4118_v33, %v4118_v33 }
 0x32e   :  { %v928_v38 = vmul.f32 %v4120_v34, %v4120_v34  ;;  %v930_v39 = vmul.f32 %v4122_v35, %v4122_v35 }
 0x32f   :  { %v931_v40 = vrot.slane %v927_v36, 4  ;;  %v943_v41 = vrot.slane %v929_v37, 4 }
 0x330   :  { %v937_v42 = vrot.slane %v928_v38, 4  ;;  %v949_v43 = vrot.slane %v930_v39, 4 }
 0x331   :  { %v932_v44 = vadd.f32 %v931_v40, %v927_v36  ;;  %v944_v45 = vadd.f32 %v943_v41, %v929_v37  ;;  %v1038_v37 = vrot.slane %v894_v28, %v4142_v30  ;;  %v1034_v40 = vrot.slane %v894_v28, %v4145_v31 }
 0x332   :  { %v938_v46 = vadd.f32 %v937_v42, %v928_v38  ;;  %v950_v47 = vadd.f32 %v949_v43, %v930_v39  ;;  %v1030_v38 = vrot.slane %v894_v28, %v4091_v23  ;;  %v1026_v39 = vrot.slane %v894_v28, %v4088_v22  ;;  %v1231_v28 = vld [vmem:[#allocation6 + $0x540] sm:$0xff] }
 0x333   :  { %v933_v51 = vrot.slane %v932_v44, 2  ;;  %v945_v55 = vrot.slane %v944_v45, 2 }
 0x334   :  { %v939_v56 = vrot.slane %v938_v46, 2  ;;  %v951_v57 = vrot.slane %v950_v47, 2 }
 0x335   :  { %v934_v58 = vadd.f32 %v933_v51, %v932_v44  ;;  %v946_v59 = vadd.f32 %v945_v55, %v944_v45 }
 0x336   :  { %v940_v60 = vadd.f32 %v939_v56, %v938_v46  ;;  %v952_v61 = vadd.f32 %v951_v57, %v950_v47 }
 0x337   :  { %v935_v62 = vrot.slane %v934_v58, 1  ;;  %v947_v63 = vrot.slane %v946_v59, 1 }
 0x338   :  { %v941_v0 = vrot.slane %v940_v60, 1  ;;  %v953_v1 = vrot.slane %v952_v61, 1 }
 0x339   :  { %v936_v2 = vadd.f32 %v935_v62, %v934_v58  ;;  %v948_v3 = vadd.f32 %v947_v63, %v946_v59  ;;  %v1199_v62 = vld [vmem:[#allocation6 + $0x440] sm:$0xff] }
 0x33a   :  { %v942_v4 = vadd.f32 %v941_v0, %v940_v60  ;;  %v954_v5 = vadd.f32 %v953_v1, %v952_v61  ;;  %v1200_v0 = vld [vmem:[#allocation6 + $0x448] sm:$0xff] }
 0x33b   :  { %v955_v6 = vmul.f32 0.125, %v936_v2  ;;  %v957_v7 = vmul.f32 0.125, %v948_v3  ;;  %v1207_v3 = vld [vmem:[#allocation6 + $0x480] sm:$0xff] }
 0x33c   :  { %v956_v8 = vmul.f32 0.125, %v942_v4  ;;  %v958_v9 = vmul.f32 0.125, %v954_v5 }
 0x33d   :  { %v959_v10 = vadd.f32 1e-05, %v955_v6  ;;  %v961_v11 = vadd.f32 1e-05, %v957_v7  ;;  %v1211_v6 = vld [vmem:[#allocation6 + $0x4a0] sm:$0xff]  ;;  %v1208_v7 = vld [vmem:[#allocation6 + $0x488] sm:$0xff] }
 0x33e   :  { %v960_v12 = vadd.f32 1e-05, %v956_v8  ;;  %v962_v13 = vadd.f32 1e-05, %v958_v9  ;;  %v1212_v8 = vld [vmem:[#allocation6 + $0x4a8] sm:$0xff]  ;;  %v3529_v48 = vcombine.low %v1207_v3, %v1211_v6 }
 0x33f   :  { %3839 = vrsqrt.f32 %v959_v10  ;;  %v3531_v49 = vcombine.low %v1208_v7, %v1212_v8 }
 0x340   :  { %3841 = vrsqrt.f32 %v961_v11 }
 0x341   :  { %3843 = vrsqrt.f32 %v960_v12  ;;  %v3530_v12 = vcombine.high %v1207_v3, %v1211_v6 }
 0x342   :  { %3845 = vrsqrt.f32 %v962_v13  ;;  %v3532_v13 = vcombine.high %v1208_v7, %v1212_v8  ;;  %v1263_v7 = vld [vmem:[#allocation6 + $0x640] sm:$0xff] }
 0x343   :  { %v1267_v8 = vld [vmem:[#allocation6 + $0x660] sm:$0xff] }
 0x349   :  { %v3840_v15 = vpop.eup %3839 }
 0x34a   :  { %v3842_v17 = vpop.eup %3841 }
 0x34b   :  { %v3844_v18 = vpop.eup %3843 }
 0x34c   :  { %v3846_v19 = vpop.eup %3845  ;;  %v971_v20 = vcombine.low %v3840_v15, %v3844_v18  ;;  %v1215_v15 = vld [vmem:[#allocation6 + $0x4c0] sm:$0xff]  ;;  %v1216_v18 = vld [vmem:[#allocation6 + $0x4c8] sm:$0xff] }
 0x34d   :  { %v972_v21 = vcombine.low %v3842_v17, %v3846_v19  ;;  %v1219_v17 = vld [vmem:[#allocation6 + $0x4e0] sm:$0xff]  ;;  %v1220_v19 = vld [vmem:[#allocation6 + $0x4e8] sm:$0xff] }
 0x34e   :  { %v979_v24 = vrot.slane %v971_v20, %v4080_v16  ;;  %v3538_v50 = vcombine.high %v1215_v15, %v1219_v17  ;;  %v3540_v52 = vcombine.high %v1216_v18, %v1220_v19  ;;  %v1224_v20 = vld [vmem:[#allocation6 + $0x508] sm:$0xff] }
 0x34f   :  { %v986_v25 = vrot.slane %v972_v21, %v4080_v16  ;;  %v1228_v21 = vld [vmem:[#allocation6 + $0x528] sm:$0xff] }
 0x351   :  { %v987_v26 = vcombine.low %v979_v24, %v986_v25  ;;  %v3537_v24 = vcombine.low %v1215_v15, %v1219_v17  ;;  %v3539_v25 = vcombine.low %v1216_v18, %v1220_v19  ;;  %v3586_v15 = vcombine.high %v1263_v7, %v1267_v8  ;;  %v1271_v18 = vld [vmem:[#allocation6 + $0x680] sm:$0xff] }
 0x352   :  { %v1275_v19 = vld [vmem:[#allocation6 + $0x6a0] sm:$0xff] }
 0x353   :  { %v994_v29 = vrot.slane %v987_v26, %v4080_v16 }
 0x355   :  { %v996_v36 = vmul.f32 %v994_v29, %v893_v27  ;;  %v3548_v27 = vcombine.high %v1224_v20, %v1228_v21  ;;  %v1235_v29 = vld [vmem:[#allocation6 + $0x560] sm:$0xff] }
 0x357   :  { %v1013_v41 = vrot.slane %v996_v36, %v4142_v30  ;;  %v1005_v42 = vrot.slane %v996_v36, %v4091_v23  ;;  %v1001_v43 = vrot.slane %v996_v36, %v4088_v22  ;;  %v1009_v44 = vrot.slane %v996_v36, %v4145_v31  ;;  %v1232_v36 = vld [vmem:[#allocation6 + $0x548] sm:$0xff] }
 0x359   :  { %v1021_v45 = vmul.f32 %v1013_v41, %v4122_v35  ;;  %v1019_v46 = vmul.f32 %v1005_v42, %v4120_v34  ;;  %v1018_v47 = vmul.f32 %v1001_v43, %v4116_v32  ;;  %v1020_v51 = vmul.f32 %v1009_v44, %v4118_v33  ;;  %v1203_v35 = vld [vmem:[#allocation6 + $0x460] sm:$0xff]  ;;  %v1204_v34 = vld [vmem:[#allocation6 + $0x468] sm:$0xff] }
 0x35a   :  { %v3522_v4 = vcombine.high %v1199_v62, %v1203_v35  ;;  %v3524_v5 = vcombine.high %v1200_v0, %v1204_v34  ;;  %v3521_v10 = vcombine.low %v1199_v62, %v1203_v35  ;;  %v3523_v11 = vcombine.low %v1200_v0, %v1204_v34  ;;  %v1239_v42 = vld [vmem:[#allocation6 + $0x580] sm:$0xff]  ;;  %v1240_v44 = vld [vmem:[#allocation6 + $0x588] sm:$0xff] }
 0x35b   :  { %v1046_v55 = vadd.f32 %v1038_v37, %v1021_v45  ;;  %v1044_v56 = vadd.f32 %v1030_v38, %v1019_v46  ;;  %v1043_v57 = vadd.f32 %v1026_v39, %v1018_v47  ;;  %v4159_v58 = vadd.f32 %v1034_v40, %v1020_v51  ;;  %v1236_v37 = vld [vmem:[#allocation6 + $0x568] sm:$0xff]  ;;  %v1243_v43 = vld [vmem:[#allocation6 + $0x5a0] sm:$0xff] }
 0x35c   :  { %v3547_v39 = vcombine.low %v1224_v20, %v1228_v21  ;;  %v3554_v40 = vcombine.high %v1231_v28, %v1235_v29  ;;  %v3556_v41 = vcombine.high %v1232_v36, %v1236_v37  ;;  %v1244_v45 = vld [vmem:[#allocation6 + $0x5a8] sm:$0xff]  ;;  %v3553_v46 = vcombine.low %v1231_v28, %v1235_v29  ;;  %v1255_v0 = vld [vmem:[#allocation6 + $0x600] sm:$0xff] }
 0x35d   :  { %v1054_v59 = vmul.f32 0.2, %v1046_v55  ;;  %vm1048_vm4 = vcmp.gt.f32.partialorder %v1044_v56, 0.0  ;;  %v1052_v60 = vmul.f32 0.2, %v1044_v56  ;;  %vm1047_vm5 = vcmp.gt.f32.partialorder %v1043_v57, 0.0 }
 0x35e   :  { %v1051_v61 = vmul.f32 0.2, %v1043_v57  ;;  %vm1050_vm6 = vcmp.gt.f32.partialorder %v1046_v55, 0.0  ;;  %v3555_v47 = vcombine.low %v1232_v36, %v1236_v37  ;;  %v3562_v51 = vcombine.high %v1239_v42, %v1243_v43  ;;  %v1259_v34 = vld [vmem:[#allocation6 + $0x620] sm:$0xff] }
 0x35f   :  { %v1056_v63 = vsel %vm1048_vm4, %v1044_v56, %v1052_v60  ;;  %v1058_v33 = vsel %vm1050_vm6, %v1046_v55, %v1054_v59  ;;  %v3564_v55 = vcombine.high %v1240_v44, %v1244_v45  ;;  %v1247_v56 = vld [vmem:[#allocation6 + $0x5c0] sm:$0xff]  ;;  %v1248_v59 = vld [vmem:[#allocation6 + $0x5c8] sm:$0xff]  ;;  %v3563_v62 = vcombine.low %v1240_v44, %v1244_v45 }
 0x360   :  { %v4161_v1 = vpack.c.bf16 %v1056_v63, %v1056_v63  ;;  %v1055_v32 = vsel %vm1047_vm5, %v1043_v57, %v1051_v61  ;;  %v4169_v9 = vpack.c.bf16 %v1058_v33, %v1058_v33  ;;  %v1251_v57 = vld [vmem:[#allocation6 + $0x5e0] sm:$0xff]  ;;  %v1252_v60 = vld [vmem:[#allocation6 + $0x5e8] sm:$0xff]  ;;  %v3561_v61 = vcombine.low %v1239_v42, %v1243_v43 }
 0x361   :  { %v4163_v2 = vpack.c.bf16 %v1055_v32, %v1055_v32  ;;  %v3570_v63 = vcombine.high %v1247_v56, %v1251_v57  ;;  %v3572_v35 = vcombine.high %v1248_v59, %v1252_v60  ;;  %v1256_v32 = vld [vmem:[#allocation6 + $0x608] sm:$0xff]  ;;  %v3569_v3 = vcombine.low %v1247_v56, %v1251_v57  ;;  %v1279_v20 = vld [vmem:[#allocation6 + $0x6c0] sm:$0xff] }
 0x362   :  { %2631 = vmatprep.mubr.bf16.mxu0 %v4161_v1  ;;  %2713 = vmatprep.mubr.bf16.mxu1 %v4161_v1  ;;  %v1260_v33 = vld [vmem:[#allocation6 + $0x628] sm:$0xff]  ;;  %v1283_v21 = vld [vmem:[#allocation6 + $0x6e0] sm:$0xff]  ;;  %vm1049_vm7 = vcmp.gt.f32.partialorder %v4159_v58, 0.0 }
 0x363   :  { %2632 = vmatmul.mubr.bf16.vlgmr.msra.gmra.mrb[8].mxu0 %v4163_v2  ;;  %2714 = vmatmul.mubr.bf16.vlgmr.msra.gmra.mrb[8].mxu1 %v4163_v2  ;;  %v3580_v6 = vcombine.high %v1256_v32, %v1260_v33  ;;  %v3602_v28 = vcombine.high %v1279_v20, %v1283_v21  ;;  %v1287_v36 = vld [vmem:[#allocation6 + $0x700] sm:$0xff] }
 0x364   :  { %2641 = vmatpush1.bf16.msra.mxu0 %v3513_v53  ;;  %2723 = vmatpush1.bf16.msra.mxu1 %v3515_v54  ;;  %v1223_v53 = vld [vmem:[#allocation6 + $0x500] sm:$0xff] }
 0x365   :  { %2672 = vmatprep.mubr.bf16.mxu0 %v4169_v9  ;;  %2754 = vmatprep.mubr.bf16.mxu1 %v4169_v9  ;;  %v1227_v54 = vld [vmem:[#allocation6 + $0x520] sm:$0xff] }
 0x366   :  { %2642 = vmatprep.subr.bf16.mxu0 %v3522_v4  ;;  %2724 = vmatprep.subr.bf16.mxu1 %v3524_v5  ;;  %v3546_v26 = vcombine.high %v1223_v53, %v1227_v54  ;;  %v3545_v38 = vcombine.low %v1223_v53, %v1227_v54  ;;  %v3571_v4 = vcombine.low %v1248_v59, %v1252_v60  ;;  %v1291_v37 = vld [vmem:[#allocation6 + $0x720] sm:$0xff] }
 0x367   :  { %v3578_v5 = vcombine.high %v1255_v0, %v1259_v34  ;;  %v3594_v53 = vcombine.high %v1271_v18, %v1275_v19  ;;  %v3610_v42 = vcombine.high %v1287_v36, %v1291_v37  ;;  %v1295_v44 = vld [vmem:[#allocation6 + $0x740] sm:$0xff] }
 0x368   :  { %2643 = vmatpush1.bf16.msra.mxu0 %v3521_v10  ;;  %2725 = vmatpush1.bf16.msra.mxu1 %v3523_v11  ;;  %v1264_v10 = vld [vmem:[#allocation6 + $0x648] sm:$0xff]  ;;  %v1299_v45 = vld [vmem:[#allocation6 + $0x760] sm:$0xff] }
 0x369   :  { %2644 = vmatprep.subr.bf16.mxu0 %v3530_v12  ;;  %2726 = vmatprep.subr.bf16.mxu1 %v3532_v13  ;;  %v1268_v11 = vld [vmem:[#allocation6 + $0x668] sm:$0xff]  ;;  %v3577_v12 = vcombine.low %v1255_v0, %v1259_v34  ;;  %v3579_v13 = vcombine.low %v1256_v32, %v1260_v33  ;;  %v3618_v56 = vcombine.high %v1295_v44, %v1299_v45  ;;  %v1303_v59 = vld [vmem:[#allocation6 + $0x780] sm:$0xff] }
 0x36a   :  { %v3588_v17 = vcombine.high %v1264_v10, %v1268_v11  ;;  %v1307_v60 = vld [vmem:[#allocation6 + $0x7a0] sm:$0xff] }
 0x36b   :  { %v3626_v0 = vcombine.high %v1303_v59, %v1307_v60  ;;  %v1311_v32 = vld [vmem:[#allocation6 + $0x7c0] sm:$0xff] }
 0x36c   :  { %2645 = vmatpush1.bf16.msra.mxu0 %v3529_v48  ;;  %2727 = vmatpush1.bf16.msra.mxu1 %v3531_v49  ;;  %v1272_v48 = vld [vmem:[#allocation6 + $0x688] sm:$0xff]  ;;  %v1315_v33 = vld [vmem:[#allocation6 + $0x7e0] sm:$0xff] }
 0x36d   :  { %2646 = vmatprep.subr.bf16.mxu0 %v3538_v50  ;;  %2728 = vmatprep.subr.bf16.mxu1 %v3540_v52  ;;  %v1276_v49 = vld [vmem:[#allocation6 + $0x6a8] sm:$0xff]  ;;  %v3585_v50 = vcombine.low %v1263_v7, %v1267_v8  ;;  %v3587_v52 = vcombine.low %v1264_v10, %v1268_v11  ;;  %v3634_v7 = vcombine.high %v1311_v32, %v1315_v33  ;;  %v1065_v10 = vld [vmem:[#allocation6 + $0x10] sm:$0xff]  ;;  %v1053_v11 = vmul.f32 0.2, %v4159_v58 }
 0x36e   :  { %v3596_v54 = vcombine.high %v1272_v48, %v1276_v49 }
 0x370   :  { %2647 = vmatpush1.bf16.msra.mxu0 %v3537_v24  ;;  %2729 = vmatpush1.bf16.msra.mxu1 %v3539_v25  ;;  %v1280_v24 = vld [vmem:[#allocation6 + $0x6c8] sm:$0xff] }
 0x371   :  { %2648 = vmatprep.subr.bf16.mxu0 %v3546_v26  ;;  %2730 = vmatprep.subr.bf16.mxu1 %v3548_v27  ;;  %v1284_v25 = vld [vmem:[#allocation6 + $0x6e8] sm:$0xff]  ;;  %v3593_v26 = vcombine.low %v1271_v18, %v1275_v19  ;;  %v3595_v27 = vcombine.low %v1272_v48, %v1276_v49  ;;  %v1057_v49 = vsel %vm1049_vm7, %v4159_v58, %v1053_v11  ;;  %v1082_v58 = vld [vmem:[#allocation6 + $0x98] sm:$0xff] }
 0x372   :  { %v3604_v29 = vcombine.high %v1280_v24, %v1284_v25 }
 0x374   :  { %2649 = vmatpush1.bf16.msra.mxu0 %v3545_v38  ;;  %2731 = vmatpush1.bf16.msra.mxu1 %v3547_v39  ;;  %v1288_v38 = vld [vmem:[#allocation6 + $0x708] sm:$0xff] }
 0x375   :  { %2650 = vmatprep.subr.bf16.mxu0 %v3554_v40  ;;  %2732 = vmatprep.subr.bf16.mxu1 %v3556_v41  ;;  %v1292_v39 = vld [vmem:[#allocation6 + $0x728] sm:$0xff]  ;;  %v3601_v40 = vcombine.low %v1279_v20, %v1283_v21  ;;  %v3603_v41 = vcombine.low %v1280_v24, %v1284_v25  ;;  %v4182_v21 = vpack.c.bf16 %v1057_v49, %v1057_v49 }
 0x376   :  { %v3612_v43 = vcombine.high %v1288_v38, %v1292_v39 }
 0x378   :  { %2651 = vmatpush1.bf16.msra.mxu0 %v3553_v46  ;;  %2733 = vmatpush1.bf16.msra.mxu1 %v3555_v47  ;;  %v1296_v46 = vld [vmem:[#allocation6 + $0x748] sm:$0xff] }
 0x379   :  { %2652 = vmatprep.subr.bf16.mxu0 %v3562_v51  ;;  %2734 = vmatprep.subr.bf16.mxu1 %v3564_v55  ;;  %v1300_v47 = vld [vmem:[#allocation6 + $0x768] sm:$0xff]  ;;  %v3609_v51 = vcombine.low %v1287_v36, %v1291_v37  ;;  %v3611_v55 = vcombine.low %v1288_v38, %v1292_v39 }
 0x37a   :  { %v3620_v57 = vcombine.high %v1296_v46, %v1300_v47 }
 0x37c   :  { %2653 = vmatpush1.bf16.msra.mxu0 %v3561_v61  ;;  %2735 = vmatpush1.bf16.msra.mxu1 %v3563_v62  ;;  %v1304_v61 = vld [vmem:[#allocation6 + $0x788] sm:$0xff] }
 0x37d   :  { %2654 = vmatprep.subr.bf16.mxu0 %v3570_v63  ;;  %2736 = vmatprep.subr.bf16.mxu1 %v3572_v35  ;;  %v1308_v62 = vld [vmem:[#allocation6 + $0x7a8] sm:$0xff]  ;;  %v3617_v63 = vcombine.low %v1295_v44, %v1299_v45  ;;  %v3619_v35 = vcombine.low %v1296_v46, %v1300_v47 }
 0x37e   :  { %v3628_v34 = vcombine.high %v1304_v61, %v1308_v62 }
 0x380   :  { %2655 = vmatpush1.bf16.msra.mxu0 %v3569_v3  ;;  %2737 = vmatpush1.bf16.msra.mxu1 %v3571_v4  ;;  %v1312_v3 = vld [vmem:[#allocation6 + $0x7c8] sm:$0xff] }
 0x381   :  { %2656 = vmatprep.subr.bf16.mxu0 %v3578_v5  ;;  %2738 = vmatprep.subr.bf16.mxu1 %v3580_v6  ;;  %v1316_v4 = vld [vmem:[#allocation6 + $0x7e8] sm:$0xff]  ;;  %v3625_v5 = vcombine.low %v1303_v59, %v1307_v60  ;;  %v3627_v6 = vcombine.low %v1304_v61, %v1308_v62  ;;  %v1105_v62 = vld [vmem:[#allocation6 + $0x150] sm:$0xff] }
 0x382   :  { %v3636_v8 = vcombine.high %v1312_v3, %v1316_v4  ;;  %v3635_v18 = vcombine.low %v1312_v3, %v1316_v4  ;;  %v1113_v4 = vld [vmem:[#allocation6 + $0x190] sm:$0xff] }
 0x384   :  { %2657 = vmatpush1.bf16.msra.mxu0 %v3577_v12  ;;  %2739 = vmatpush1.bf16.msra.mxu1 %v3579_v13  ;;  %v1069_v12 = vld [vmem:[#allocation6 + $0x30] sm:$0xff]  ;;  %v1066_v13 = vld [vmem:[#allocation6 + $0x18] sm:$0xff] }
 0x385   :  { %2658 = vmatprep.subr.bf16.mxu0 %v3586_v15  ;;  %2740 = vmatprep.subr.bf16.mxu1 %v3588_v17  ;;  %v1070_v15 = vld [vmem:[#allocation6 + $0x38] sm:$0xff]  ;;  %v3633_v17 = vcombine.low %v1311_v32, %v1315_v33  ;;  %v3390_v19 = vcombine.high %v1065_v10, %v1069_v12  ;;  %v3389_v20 = vcombine.low %v1065_v10, %v1069_v12 }
 0x386   :  { %v3392_v48 = vcombine.high %v1066_v13, %v1070_v15  ;;  %v3391_v24 = vcombine.low %v1066_v13, %v1070_v15  ;;  %v1121_v13 = vld [vmem:[#allocation6 + $0x1d0] sm:$0xff] }
 0x387   :  { %v1125_v15 = vld [vmem:[#allocation6 + $0x1f0] sm:$0xff] }
 0x388   :  { %2659 = vmatpush1.bf16.msra.mxu0 %v3585_v50  ;;  %2741 = vmatpush1.bf16.msra.mxu1 %v3587_v52  ;;  %v1073_v50 = vld [vmem:[#allocation6 + $0x50] sm:$0xff]  ;;  %v3446_v49 = vcombine.high %v1121_v13, %v1125_v15 }
 0x389   :  { %2660 = vmatprep.subr.bf16.mxu0 %v3594_v53  ;;  %2742 = vmatprep.subr.bf16.mxu1 %v3596_v54  ;;  %v1077_v52 = vld [vmem:[#allocation6 + $0x70] sm:$0xff]  ;;  %v1074_v53 = vld [vmem:[#allocation6 + $0x58] sm:$0xff] }
 0x38a   :  { %v1078_v54 = vld [vmem:[#allocation6 + $0x78] sm:$0xff]  ;;  %v3398_v25 = vcombine.high %v1073_v50, %v1077_v52  ;;  %v3397_v36 = vcombine.low %v1073_v50, %v1077_v52  ;;  %v1129_v52 = vld [vmem:[#allocation6 + $0x210] sm:$0xff] }
 0x38b   :  { %v3399_v37 = vcombine.low %v1074_v53, %v1078_v54 }
 0x38c   :  { %2661 = vmatpush1.bf16.msra.mxu0 %v3593_v26  ;;  %2743 = vmatpush1.bf16.msra.mxu1 %v3595_v27  ;;  %v3400_v26 = vcombine.high %v1074_v53, %v1078_v54  ;;  %v1081_v27 = vld [vmem:[#allocation6 + $0x90] sm:$0xff]  ;;  %v1130_v54 = vld [vmem:[#allocation6 + $0x218] sm:$0xff] }
 0x38d   :  { %2662 = vmatprep.subr.bf16.mxu0 %v3602_v28  ;;  %2744 = vmatprep.subr.bf16.mxu1 %v3604_v29  ;;  %v1085_v28 = vld [vmem:[#allocation6 + $0xb0] sm:$0xff]  ;;  %v1086_v29 = vld [vmem:[#allocation6 + $0xb8] sm:$0xff] }
 0x38e   :  { %v3406_v38 = vcombine.high %v1081_v27, %v1085_v28  ;;  %v3408_v39 = vcombine.high %v1082_v58, %v1086_v29  ;;  %v3405_v44 = vcombine.low %v1081_v27, %v1085_v28  ;;  %v3407_v45 = vcombine.low %v1082_v58, %v1086_v29  ;;  %v1133_v53 = vld [vmem:[#allocation6 + $0x230] sm:$0xff]  ;;  %v1138_v29 = vld [vmem:[#allocation6 + $0x258] sm:$0xff] }
 0x38f   :  { %v1137_v28 = vld [vmem:[#allocation6 + $0x250] sm:$0xff] }
 0x390   :  { %2663 = vmatpush1.bf16.msra.mxu0 %v3601_v40  ;;  %2745 = vmatpush1.bf16.msra.mxu1 %v3603_v41  ;;  %v1089_v40 = vld [vmem:[#allocation6 + $0xd0] sm:$0xff] }
 0x391   :  { %2664 = vmatprep.subr.bf16.mxu0 %v3610_v42  ;;  %2746 = vmatprep.subr.bf16.mxu1 %v3612_v43  ;;  %v1093_v41 = vld [vmem:[#allocation6 + $0xf0] sm:$0xff]  ;;  %v1090_v42 = vld [vmem:[#allocation6 + $0xd8] sm:$0xff] }
 0x392   :  { %v1094_v43 = vld [vmem:[#allocation6 + $0xf8] sm:$0xff]  ;;  %v3414_v46 = vcombine.high %v1089_v40, %v1093_v41  ;;  %v1141_v58 = vld [vmem:[#allocation6 + $0x270] sm:$0xff] }
 0x393   :  { %v3416_v47 = vcombine.high %v1090_v42, %v1094_v43  ;;  %v3415_v59 = vcombine.low %v1090_v42, %v1094_v43  ;;  %v1149_v42 = vld [vmem:[#allocation6 + $0x2b0] sm:$0xff]  ;;  %v1146_v43 = vld [vmem:[#allocation6 + $0x298] sm:$0xff] }
 0x394   :  { %2665 = vmatpush1.bf16.msra.mxu0 %v3609_v51  ;;  %2747 = vmatpush1.bf16.msra.mxu1 %v3611_v55  ;;  %v1097_v51 = vld [vmem:[#allocation6 + $0x110] sm:$0xff] }
 0x395   :  { %2666 = vmatprep.subr.bf16.mxu0 %v3618_v56  ;;  %2748 = vmatprep.subr.bf16.mxu1 %v3620_v57  ;;  %v1101_v55 = vld [vmem:[#allocation6 + $0x130] sm:$0xff]  ;;  %v1102_v56 = vld [vmem:[#allocation6 + $0x138] sm:$0xff]  ;;  %v3413_v57 = vcombine.low %v1089_v40, %v1093_v41 }
 0x396   :  { %v3422_v60 = vcombine.high %v1097_v51, %v1101_v55  ;;  %v1145_v41 = vld [vmem:[#allocation6 + $0x290] sm:$0xff] }
 0x398   :  { %2667 = vmatpush1.bf16.msra.mxu0 %v3617_v63  ;;  %2749 = vmatpush1.bf16.msra.mxu1 %v3619_v35  ;;  %v1109_v63 = vld [vmem:[#allocation6 + $0x170] sm:$0xff]  ;;  %v1106_v35 = vld [vmem:[#allocation6 + $0x158] sm:$0xff] }
 0x399   :  { %2668 = vmatprep.subr.bf16.mxu0 %v3626_v0  ;;  %2750 = vmatprep.subr.bf16.mxu1 %v3628_v34  ;;  %v1110_v0 = vld [vmem:[#allocation6 + $0x178] sm:$0xff]  ;;  %v3421_v34 = vcombine.low %v1097_v51, %v1101_v55  ;;  %v3430_v33 = vcombine.high %v1105_v62, %v1109_v63  ;;  %v1153_v55 = vld [vmem:[#allocation6 + $0x2d0] sm:$0xff] }
 0x39a   :  { %v3432_v3 = vcombine.high %v1106_v35, %v1110_v0  ;;  %v3431_v10 = vcombine.low %v1106_v35, %v1110_v0  ;;  %v1165_v35 = vld [vmem:[#allocation6 + $0x330] sm:$0xff]  ;;  %v1162_v0 = vld [vmem:[#allocation6 + $0x318] sm:$0xff] }
 0x39c   :  { %2669 = vmatpush1.bf16.msra.mxu0 %v3625_v5  ;;  %2751 = vmatpush1.bf16.msra.mxu1 %v3627_v6  ;;  %v1117_v5 = vld [vmem:[#allocation6 + $0x1b0] sm:$0xff]  ;;  %v1114_v6 = vld [vmem:[#allocation6 + $0x198] sm:$0xff] }
 0x39d   :  { %2670 = vmatprep.subr.bf16.mxu0 %v3634_v7  ;;  %2752 = vmatprep.subr.bf16.mxu1 %v3636_v8  ;;  %v1118_v7 = vld [vmem:[#allocation6 + $0x1b8] sm:$0xff]  ;;  %v3429_v8 = vcombine.low %v1105_v62, %v1109_v63  ;;  %v3438_v11 = vcombine.high %v1113_v4, %v1117_v5  ;;  %v1161_v63 = vld [vmem:[#allocation6 + $0x310] sm:$0xff] }
 0x39e   :  { %v3440_v12 = vcombine.high %v1114_v6, %v1118_v7 }
 0x3a0   :  { %2671 = vmatpush1.bf16.msra.mxu0 %v3633_v17  ;;  %2753 = vmatpush1.bf16.msra.mxu1 %v3635_v18  ;;  %v1122_v17 = vld [vmem:[#allocation6 + $0x1d8] sm:$0xff] }
 0x3a1   :  { %2763 = vmatprep.subr.bf16.mxu0 %v3390_v19  ;;  %2845 = vmatprep.subr.bf16.mxu1 %v3392_v48  ;;  %v1126_v18 = vld [vmem:[#allocation6 + $0x1f8] sm:$0xff]  ;;  %v3437_v19 = vcombine.low %v1113_v4, %v1117_v5  ;;  %v3439_v48 = vcombine.low %v1114_v6, %v1118_v7  ;;  %v1169_v5 = vld [vmem:[#allocation6 + $0x350] sm:$0xff] }
 0x3a2   :  { %v3448_v50 = vcombine.high %v1122_v17, %v1126_v18  ;;  %v1173_v6 = vld [vmem:[#allocation6 + $0x370] sm:$0xff]  ;;  %v1170_v7 = vld [vmem:[#allocation6 + $0x358] sm:$0xff] }
 0x3a3   :  { %2673 = vmatmul.mubr.bf16.vlgmr.msra.gmra.mrb[8].mxu0 %v4182_v21  ;;  %2755 = vmatmul.mubr.bf16.vlgmr.msra.gmra.mrb[8].mxu1 %v4182_v21 }
 0x3a4   :  { %2764 = vmatpush1.bf16.msra.mxu0 %v3389_v20  ;;  %2795 = vmatprep.mubr.bf16.mxu0 %v4161_v1  ;;  %v1134_v20 = vld [vmem:[#allocation6 + $0x238] sm:$0xff] }
 0x3a5   :  { %2846 = vmatpush1.bf16.msra.mxu1 %v3391_v24  ;;  %2877 = vmatprep.mubr.bf16.mxu1 %v4161_v1  ;;  %v1098_v1 = vld [vmem:[#allocation6 + $0x118] sm:$0xff]  ;;  %v3445_v24 = vcombine.low %v1121_v13, %v1125_v15  ;;  %v3456_v27 = vcombine.high %v1130_v54, %v1134_v20  ;;  %v1177_v15 = vld [vmem:[#allocation6 + $0x390] sm:$0xff] }
 0x3a6   :  { %2765 = vmatprep.subr.bf16.mxu0 %v3398_v25  ;;  %2847 = vmatprep.subr.bf16.mxu1 %v3400_v26  ;;  %v3424_v61 = vcombine.high %v1098_v1, %v1102_v56  ;;  %v3423_v32 = vcombine.low %v1098_v1, %v1102_v56  ;;  %v3447_v25 = vcombine.low %v1122_v17, %v1126_v18  ;;  %v1157_v1 = vld [vmem:[#allocation6 + $0x2f0] sm:$0xff]  ;;  %v1154_v56 = vld [vmem:[#allocation6 + $0x2d8] sm:$0xff] }
 0x3a7   :  { %v3454_v26 = vcombine.high %v1129_v52, %v1133_v53  ;;  %v1181_v17 = vld [vmem:[#allocation6 + $0x3b0] sm:$0xff]  ;;  %v1178_v18 = vld [vmem:[#allocation6 + $0x398] sm:$0xff] }
 0x3a8   :  { %2766 = vmatpush1.bf16.msra.mxu0 %v3397_v36  ;;  %v1142_v36 = vld [vmem:[#allocation6 + $0x278] sm:$0xff] }
 0x3a9   :  { %2848 = vmatpush1.bf16.msra.mxu1 %v3399_v37  ;;  %2767 = vmatprep.subr.bf16.mxu0 %v3406_v38  ;;  %v3453_v37 = vcombine.low %v1129_v52, %v1133_v53  ;;  %v3455_v38 = vcombine.low %v1130_v54, %v1134_v20  ;;  %v3464_v40 = vcombine.high %v1138_v29, %v1142_v36  ;;  %v1185_v53 = vld [vmem:[#allocation6 + $0x3d0] sm:$0xff]  ;;  %v1186_v20 = vld [vmem:[#allocation6 + $0x3d8] sm:$0xff] }
 0x3aa   :  { %2849 = vmatprep.subr.bf16.mxu1 %v3408_v39  ;;  %v3462_v39 = vcombine.high %v1137_v28, %v1141_v58  ;;  %v1189_v54 = vld [vmem:[#allocation6 + $0x3f0] sm:$0xff] }
 0x3ac   :  { %2768 = vmatpush1.bf16.msra.mxu0 %v3405_v44  ;;  %v1150_v44 = vld [vmem:[#allocation6 + $0x2b8] sm:$0xff] }
 0x3ad   :  { %2850 = vmatpush1.bf16.msra.mxu1 %v3407_v45  ;;  %2769 = vmatprep.subr.bf16.mxu0 %v3414_v46  ;;  %v3461_v45 = vcombine.low %v1137_v28, %v1141_v58  ;;  %v3463_v46 = vcombine.low %v1138_v29, %v1142_v36  ;;  %v3472_v51 = vcombine.high %v1146_v43, %v1150_v44  ;;  %v1193_v58 = vld [vmem:[#allocation6 + $0x410] sm:$0xff]  ;;  %v1194_v36 = vld [vmem:[#allocation6 + $0x418] sm:$0xff] }
 0x3ae   :  { %2851 = vmatprep.subr.bf16.mxu1 %v3416_v47  ;;  %v3470_v47 = vcombine.high %v1145_v41, %v1149_v42  ;;  %v1197_v29 = vld [vmem:[#allocation6 + $0x430] sm:$0xff] }
 0x3b0   :  { %2770 = vmatpush1.bf16.msra.mxu0 %v3413_v57  ;;  %v1158_v57 = vld [vmem:[#allocation6 + $0x2f8] sm:$0xff] }
 0x3b1   :  { %2852 = vmatpush1.bf16.msra.mxu1 %v3415_v59  ;;  %2771 = vmatprep.subr.bf16.mxu0 %v3422_v60  ;;  %v3469_v59 = vcombine.low %v1145_v41, %v1149_v42  ;;  %v3471_v60 = vcombine.low %v1146_v43, %v1150_v44  ;;  %v3480_v62 = vcombine.high %v1154_v56, %v1158_v57  ;;  %v1201_v42 = vld [vmem:[#allocation6 + $0x450] sm:$0xff] }
 0x3b2   :  { %2853 = vmatprep.subr.bf16.mxu1 %v3424_v61  ;;  %v3478_v61 = vcombine.high %v1153_v55, %v1157_v1  ;;  %v1205_v43 = vld [vmem:[#allocation6 + $0x470] sm:$0xff]  ;;  %v3517_v44 = vcombine.low %v1193_v58, %v1197_v29 }
 0x3b4   :  { %2772 = vmatpush1.bf16.msra.mxu0 %v3421_v34  ;;  %v1166_v34 = vld [vmem:[#allocation6 + $0x338] sm:$0xff] }
 0x3b5   :  { %2854 = vmatpush1.bf16.msra.mxu1 %v3423_v32  ;;  %2773 = vmatprep.subr.bf16.mxu0 %v3430_v33  ;;  %v3477_v32 = vcombine.low %v1153_v55, %v1157_v1  ;;  %v3479_v33 = vcombine.low %v1154_v56, %v1158_v57  ;;  %v3488_v4 = vcombine.high %v1162_v0, %v1166_v34  ;;  %v1209_v55 = vld [vmem:[#allocation6 + $0x490] sm:$0xff]  ;;  %v1210_v57 = vld [vmem:[#allocation6 + $0x498] sm:$0xff] }
 0x3b6   :  { %2855 = vmatprep.subr.bf16.mxu1 %v3432_v3  ;;  %v3486_v3 = vcombine.high %v1161_v63, %v1165_v35  ;;  %v1213_v1 = vld [vmem:[#allocation6 + $0x4b0] sm:$0xff] }
 0x3b8   :  { %2774 = vmatpush1.bf16.msra.mxu0 %v3429_v8  ;;  %v1174_v8 = vld [vmem:[#allocation6 + $0x378] sm:$0xff] }
 0x3b9   :  { %2856 = vmatpush1.bf16.msra.mxu1 %v3431_v10  ;;  %2775 = vmatprep.subr.bf16.mxu0 %v3438_v11  ;;  %v3485_v10 = vcombine.low %v1161_v63, %v1165_v35  ;;  %v3487_v11 = vcombine.low %v1162_v0, %v1166_v34  ;;  %v3496_v13 = vcombine.high %v1170_v7, %v1174_v8  ;;  %v1217_v35 = vld [vmem:[#allocation6 + $0x4d0] sm:$0xff]  ;;  %v1218_v34 = vld [vmem:[#allocation6 + $0x4d8] sm:$0xff] }
 0x3ba   :  { %2857 = vmatprep.subr.bf16.mxu1 %v3440_v12  ;;  %v3494_v12 = vcombine.high %v1169_v5, %v1173_v6  ;;  %v1221_v0 = vld [vmem:[#allocation6 + $0x4f0] sm:$0xff] }
 0x3bc   :  { %2776 = vmatpush1.bf16.msra.mxu0 %v3437_v19  ;;  %v1182_v19 = vld [vmem:[#allocation6 + $0x3b8] sm:$0xff] }
 0x3bd   :  { %2858 = vmatpush1.bf16.msra.mxu1 %v3439_v48  ;;  %2777 = vmatprep.subr.bf16.mxu0 %v3446_v49  ;;  %v3493_v48 = vcombine.low %v1169_v5, %v1173_v6  ;;  %v3495_v49 = vcombine.low %v1170_v7, %v1174_v8  ;;  %v3504_v52 = vcombine.high %v1178_v18, %v1182_v19  ;;  %v1225_v5 = vld [vmem:[#allocation6 + $0x510] sm:$0xff]  ;;  %v1226_v7 = vld [vmem:[#allocation6 + $0x518] sm:$0xff] }
 0x3be   :  { %2859 = vmatprep.subr.bf16.mxu1 %v3448_v50  ;;  %v3502_v50 = vcombine.high %v1177_v15, %v1181_v17  ;;  %v1229_v6 = vld [vmem:[#allocation6 + $0x530] sm:$0xff]  ;;  %v1230_v8 = vld [vmem:[#allocation6 + $0x538] sm:$0xff] }
 0x3c0   :  { %2778 = vmatpush1.bf16.msra.mxu0 %v3445_v24  ;;  %v1190_v24 = vld [vmem:[#allocation6 + $0x3f8] sm:$0xff] }
 0x3c1   :  { %2860 = vmatpush1.bf16.msra.mxu1 %v3447_v25  ;;  %2779 = vmatprep.subr.bf16.mxu0 %v3454_v26  ;;  %v3501_v25 = vcombine.low %v1177_v15, %v1181_v17  ;;  %v3503_v26 = vcombine.low %v1178_v18, %v1182_v19  ;;  %v3512_v28 = vcombine.high %v1186_v20, %v1190_v24  ;;  %v1237_v15 = vld [vmem:[#allocation6 + $0x570] sm:$0xff]  ;;  %v1234_v17 = vld [vmem:[#allocation6 + $0x558] sm:$0xff] }
 0x3c2   :  { %2861 = vmatprep.subr.bf16.mxu1 %v3456_v27  ;;  %v3510_v27 = vcombine.high %v1185_v53, %v1189_v54  ;;  %v1238_v18 = vld [vmem:[#allocation6 + $0x578] sm:$0xff]  ;;  %v3549_v19 = vcombine.low %v1225_v5, %v1229_v6 }
 0x3c4   :  { %2780 = vmatpush1.bf16.msra.mxu0 %v3453_v37  ;;  %v1198_v37 = vld [vmem:[#allocation6 + $0x438] sm:$0xff] }
 0x3c5   :  { %2862 = vmatpush1.bf16.msra.mxu1 %v3455_v38  ;;  %2781 = vmatprep.subr.bf16.mxu0 %v3462_v39  ;;  %v3509_v38 = vcombine.low %v1185_v53, %v1189_v54  ;;  %v3511_v39 = vcombine.low %v1186_v20, %v1190_v24  ;;  %v3520_v41 = vcombine.high %v1194_v36, %v1198_v37  ;;  %v1245_v53 = vld [vmem:[#allocation6 + $0x5b0] sm:$0xff]  ;;  %v1242_v54 = vld [vmem:[#allocation6 + $0x598] sm:$0xff] }
 0x3c6   :  { %2863 = vmatprep.subr.bf16.mxu1 %v3464_v40  ;;  %v3518_v40 = vcombine.high %v1193_v58, %v1197_v29  ;;  %v1246_v20 = vld [vmem:[#allocation6 + $0x5b8] sm:$0xff]  ;;  %v1253_v58 = vld [vmem:[#allocation6 + $0x5f0] sm:$0xff] }
 0x3c7   :  { %v1250_v29 = vld [vmem:[#allocation6 + $0x5d8] sm:$0xff] }
 0x3c8   :  { %2782 = vmatpush1.bf16.msra.mxu0 %v3461_v45  ;;  %v1202_v45 = vld [vmem:[#allocation6 + $0x458] sm:$0xff] }
 0x3c9   :  { %2864 = vmatpush1.bf16.msra.mxu1 %v3463_v46  ;;  %2783 = vmatprep.subr.bf16.mxu0 %v3470_v47  ;;  %v1206_v46 = vld [vmem:[#allocation6 + $0x478] sm:$0xff]  ;;  %v3519_v47 = vcombine.low %v1194_v36, %v1198_v37 }
 0x3ca   :  { %2865 = vmatprep.subr.bf16.mxu1 %v3472_v51  ;;  %v3526_v51 = vcombine.high %v1201_v42, %v1205_v43  ;;  %v3528_v56 = vcombine.high %v1202_v45, %v1206_v46  ;;  %v1254_v36 = vld [vmem:[#allocation6 + $0x5f8] sm:$0xff] }
 0x3cc   :  { %2784 = vmatpush1.bf16.msra.mxu0 %v3469_v59  ;;  %v1214_v59 = vld [vmem:[#allocation6 + $0x4b8] sm:$0xff] }
 0x3cd   :  { %2866 = vmatpush1.bf16.msra.mxu1 %v3471_v60  ;;  %2785 = vmatprep.subr.bf16.mxu0 %v3478_v61  ;;  %v3525_v60 = vcombine.low %v1201_v42, %v1205_v43  ;;  %v3527_v61 = vcombine.low %v1202_v45, %v1206_v46  ;;  %v3536_v63 = vcombine.high %v1210_v57, %v1214_v59  ;;  %v1261_v42 = vld [vmem:[#allocation6 + $0x630] sm:$0xff]  ;;  %v1258_v43 = vld [vmem:[#allocation6 + $0x618] sm:$0xff] }
 0x3ce   :  { %2867 = vmatprep.subr.bf16.mxu1 %v3480_v62  ;;  %v3534_v62 = vcombine.high %v1209_v55, %v1213_v1  ;;  %v3575_v46 = vcombine.low %v1250_v29, %v1254_v36 }
 0x3d0   :  { %2786 = vmatpush1.bf16.msra.mxu0 %v3477_v32  ;;  %v1222_v32 = vld [vmem:[#allocation6 + $0x4f8] sm:$0xff] }
 0x3d1   :  { %2868 = vmatpush1.bf16.msra.mxu1 %v3479_v33  ;;  %2787 = vmatprep.subr.bf16.mxu0 %v3486_v3  ;;  %v3533_v33 = vcombine.low %v1209_v55, %v1213_v1  ;;  %v3542_v3 = vcombine.high %v1217_v35, %v1221_v0  ;;  %v1265_v55 = vld [vmem:[#allocation6 + $0x650] sm:$0xff] }
 0x3d2   :  { %2869 = vmatprep.subr.bf16.mxu1 %v3488_v4  ;;  %v3544_v4 = vcombine.high %v1218_v34, %v1222_v32  ;;  %v1269_v1 = vld [vmem:[#allocation6 + $0x670] sm:$0xff] }
 0x3d4   :  { %2788 = vmatpush1.bf16.msra.mxu0 %v3485_v10  ;;  %v3543_v10 = vcombine.low %v1218_v34, %v1222_v32  ;;  %v1278_v34 = vld [vmem:[#allocation6 + $0x6b8] sm:$0xff]  ;;  %v3589_v32 = vcombine.low %v1265_v55, %v1269_v1 }
 0x3d5   :  { %2870 = vmatpush1.bf16.msra.mxu1 %v3487_v11  ;;  %2789 = vmatprep.subr.bf16.mxu0 %v3494_v12  ;;  %v3550_v11 = vcombine.high %v1225_v5, %v1229_v6  ;;  %v3552_v12 = vcombine.high %v1226_v7, %v1230_v8  ;;  %v1285_v5 = vld [vmem:[#allocation6 + $0x6f0] sm:$0xff]  ;;  %v1282_v6 = vld [vmem:[#allocation6 + $0x6d8] sm:$0xff] }
 0x3d6   :  { %2871 = vmatprep.subr.bf16.mxu1 %v3496_v13  ;;  %v1233_v13 = vld [vmem:[#allocation6 + $0x550] sm:$0xff] }
 0x3d7   :  { %v3557_v24 = vcombine.low %v1233_v13, %v1237_v15 }
 0x3d8   :  { %2790 = vmatpush1.bf16.msra.mxu0 %v3493_v48  ;;  %v3551_v48 = vcombine.low %v1226_v7, %v1230_v8  ;;  %v1286_v7 = vld [vmem:[#allocation6 + $0x6f8] sm:$0xff] }
 0x3d9   :  { %2872 = vmatpush1.bf16.msra.mxu1 %v3495_v49  ;;  %2791 = vmatprep.subr.bf16.mxu0 %v3502_v50  ;;  %v3558_v49 = vcombine.high %v1233_v13, %v1237_v15  ;;  %v3560_v50 = vcombine.high %v1234_v17, %v1238_v18  ;;  %v1293_v13 = vld [vmem:[#allocation6 + $0x730] sm:$0xff]  ;;  %v1290_v15 = vld [vmem:[#allocation6 + $0x718] sm:$0xff] }
 0x3da   :  { %2873 = vmatprep.subr.bf16.mxu1 %v3504_v52  ;;  %v1241_v52 = vld [vmem:[#allocation6 + $0x590] sm:$0xff] }
 0x3db   :  { %v3565_v37 = vcombine.low %v1241_v52, %v1245_v53 }
 0x3dc   :  { %2792 = vmatpush1.bf16.msra.mxu0 %v3501_v25  ;;  %v3559_v25 = vcombine.low %v1234_v17, %v1238_v18  ;;  %v1294_v17 = vld [vmem:[#allocation6 + $0x738] sm:$0xff] }
 0x3dd   :  { %2874 = vmatpush1.bf16.msra.mxu1 %v3503_v26  ;;  %2793 = vmatprep.subr.bf16.mxu0 %v3510_v27  ;;  %v3566_v26 = vcombine.high %v1241_v52, %v1245_v53  ;;  %v3568_v27 = vcombine.high %v1242_v54, %v1246_v20  ;;  %v1301_v52 = vld [vmem:[#allocation6 + $0x770] sm:$0xff]  ;;  %v1298_v53 = vld [vmem:[#allocation6 + $0x758] sm:$0xff] }
 0x3de   :  { %2875 = vmatprep.subr.bf16.mxu1 %v3512_v28  ;;  %v1249_v28 = vld [vmem:[#allocation6 + $0x5d0] sm:$0xff] }
 0x3df   :  { %v3573_v45 = vcombine.low %v1249_v28, %v1253_v58 }
 0x3e0   :  { %2794 = vmatpush1.bf16.msra.mxu0 %v3509_v38  ;;  %v3567_v38 = vcombine.low %v1242_v54, %v1246_v20  ;;  %v1302_v54 = vld [vmem:[#allocation6 + $0x778] sm:$0xff] }
 0x3e1   :  { %2876 = vmatpush1.bf16.msra.mxu1 %v3511_v39  ;;  %2804 = vmatprep.subr.bf16.mxu0 %v3518_v40  ;;  %v3574_v39 = vcombine.high %v1249_v28, %v1253_v58  ;;  %v3576_v40 = vcombine.high %v1250_v29, %v1254_v36  ;;  %v1309_v28 = vld [vmem:[#allocation6 + $0x7b0] sm:$0xff]  ;;  %v1306_v58 = vld [vmem:[#allocation6 + $0x798] sm:$0xff] }
 0x3e2   :  { %2886 = vmatprep.subr.bf16.mxu1 %v3520_v41  ;;  %v1257_v41 = vld [vmem:[#allocation6 + $0x610] sm:$0xff]  ;;  %v1310_v29 = vld [vmem:[#allocation6 + $0x7b8] sm:$0xff] }
 0x3e3   :  { %2796 = vmatmul.mubr.bf16.vlgmr.msra.gmra.mrb[12].mxu0 %v4163_v2 }
 0x3e4   :  { %2878 = vmatmul.mubr.bf16.vlgmr.msra.gmra.mrb[12].mxu1 %v4163_v2  ;;  %2805 = vmatpush1.bf16.msra.mxu0 %v3517_v44  ;;  %v3535_v2 = vcombine.low %v1210_v57, %v1214_v59  ;;  %v1262_v44 = vld [vmem:[#allocation6 + $0x638] sm:$0xff]  ;;  %v3581_v59 = vcombine.low %v1257_v41, %v1261_v42 }
 0x3e5   :  { %2836 = vmatprep.mubr.bf16.mxu0 %v4169_v9  ;;  %2887 = vmatpush1.bf16.msra.mxu1 %v3519_v47  ;;  %v3582_v47 = vcombine.high %v1257_v41, %v1261_v42  ;;  %v1270_v57 = vld [vmem:[#allocation6 + $0x678] sm:$0xff]  ;;  %v1317_v41 = vld [vmem:[#allocation6 + $0x7f0] sm:$0xff] }
 0x3e6   :  { %2918 = vmatprep.mubr.bf16.mxu1 %v4169_v9  ;;  %2806 = vmatprep.subr.bf16.mxu0 %v3526_v51  ;;  %v3541_v9 = vcombine.low %v1217_v35, %v1221_v0  ;;  %v3584_v51 = vcombine.high %v1258_v43, %v1262_v44  ;;  %v1277_v35 = vld [vmem:[#allocation6 + $0x6b0] sm:$0xff]  ;;  %v1274_v0 = vld [vmem:[#allocation6 + $0x698] sm:$0xff] }
 0x3e7   :  { %2888 = vmatprep.subr.bf16.mxu1 %v3528_v56  ;;  %v1266_v56 = vld [vmem:[#allocation6 + $0x658] sm:$0xff] }
 0x3e8   :  { %2807 = vmatpush1.bf16.msra.mxu0 %v3525_v60  ;;  %v3583_v60 = vcombine.low %v1258_v43, %v1262_v44  ;;  %v1314_v42 = vld [vmem:[#allocation6 + $0x7d8] sm:$0xff] }
 0x3e9   :  { %2889 = vmatpush1.bf16.msra.mxu1 %v3527_v61  ;;  %2808 = vmatprep.subr.bf16.mxu0 %v3534_v62  ;;  %v3590_v61 = vcombine.high %v1265_v55, %v1269_v1  ;;  %v3592_v62 = vcombine.high %v1266_v56, %v1270_v57  ;;  %v1318_v43 = vld [vmem:[#allocation6 + $0x7f8] sm:$0xff] }
 0x3ea   :  { %2890 = vmatprep.subr.bf16.mxu1 %v3536_v63  ;;  %v1273_v63 = vld [vmem:[#allocation6 + $0x690] sm:$0xff]  ;;  %v3639_v55 = vcombine.low %v1314_v42, %v1318_v43 }
 0x3eb   :  { %v3597_v8 = vcombine.low %v1273_v63, %v1277_v35 }
 0x3ec   :  { %2809 = vmatpush1.bf16.msra.mxu0 %v3533_v33  ;;  %v3591_v33 = vcombine.low %v1266_v56, %v1270_v57 }
 0x3ed   :  { %2891 = vmatpush1.bf16.msra.mxu1 %v3535_v2  ;;  %2810 = vmatprep.subr.bf16.mxu0 %v3542_v3  ;;  %v3598_v2 = vcombine.high %v1273_v63, %v1277_v35  ;;  %v3600_v3 = vcombine.high %v1274_v0, %v1278_v34 }
 0x3ee   :  { %2892 = vmatprep.subr.bf16.mxu1 %v3544_v4  ;;  %v1281_v4 = vld [vmem:[#allocation6 + $0x6d0] sm:$0xff] }
 0x3ef   :  { %v3605_v18 = vcombine.low %v1281_v4, %v1285_v5 }
 0x3f0   :  { %2811 = vmatpush1.bf16.msra.mxu0 %v3541_v9  ;;  %v3599_v9 = vcombine.low %v1274_v0, %v1278_v34 }
 0x3f1   :  { %2893 = vmatpush1.bf16.msra.mxu1 %v3543_v10  ;;  %2812 = vmatprep.subr.bf16.mxu0 %v3550_v11  ;;  %v3606_v10 = vcombine.high %v1281_v4, %v1285_v5  ;;  %v3608_v11 = vcombine.high %v1282_v6, %v1286_v7 }
 0x3f2   :  { %2894 = vmatprep.subr.bf16.mxu1 %v3552_v12  ;;  %v1289_v12 = vld [vmem:[#allocation6 + $0x710] sm:$0xff] }
 0x3f3   :  { %v3613_v20 = vcombine.low %v1289_v12, %v1293_v13 }
 0x3f4   :  { %2813 = vmatpush1.bf16.msra.mxu0 %v3549_v19  ;;  %v3607_v19 = vcombine.low %v1282_v6, %v1286_v7 }
 0x3f5   :  { %2895 = vmatpush1.bf16.msra.mxu1 %v3551_v48  ;;  %2814 = vmatprep.subr.bf16.mxu0 %v3558_v49  ;;  %v3614_v48 = vcombine.high %v1289_v12, %v1293_v13  ;;  %v3616_v49 = vcombine.high %v1290_v15, %v1294_v17 }
 0x3f6   :  { %2896 = vmatprep.subr.bf16.mxu1 %v3560_v50  ;;  %v1297_v50 = vld [vmem:[#allocation6 + $0x750] sm:$0xff] }
 0x3f7   :  { %v3621_v36 = vcombine.low %v1297_v50, %v1301_v52 }
 0x3f8   :  { %2815 = vmatpush1.bf16.msra.mxu0 %v3557_v24  ;;  %v3615_v24 = vcombine.low %v1290_v15, %v1294_v17 }
 0x3f9   :  { %2897 = vmatpush1.bf16.msra.mxu1 %v3559_v25  ;;  %2816 = vmatprep.subr.bf16.mxu0 %v3566_v26  ;;  %v3622_v25 = vcombine.high %v1297_v50, %v1301_v52  ;;  %v3624_v26 = vcombine.high %v1298_v53, %v1302_v54 }
 0x3fa   :  { %2898 = vmatprep.subr.bf16.mxu1 %v3568_v27  ;;  %v1305_v27 = vld [vmem:[#allocation6 + $0x790] sm:$0xff] }
 0x3fb   :  { %v3629_v44 = vcombine.low %v1305_v27, %v1309_v28 }
 0x3fc   :  { %2817 = vmatpush1.bf16.msra.mxu0 %v3565_v37  ;;  %v3623_v37 = vcombine.low %v1298_v53, %v1302_v54 }
 0x3fd   :  { %2899 = vmatpush1.bf16.msra.mxu1 %v3567_v38  ;;  %2818 = vmatprep.subr.bf16.mxu0 %v3574_v39  ;;  %v3630_v38 = vcombine.high %v1305_v27, %v1309_v28  ;;  %v3632_v39 = vcombine.high %v1306_v58, %v1310_v29 }
 0x3fe   :  { %2900 = vmatprep.subr.bf16.mxu1 %v3576_v40  ;;  %v1313_v40 = vld [vmem:[#allocation6 + $0x7d0] sm:$0xff] }
 0x400   :  { %2819 = vmatpush1.bf16.msra.mxu0 %v3573_v45  ;;  %v3631_v45 = vcombine.low %v1306_v58, %v1310_v29 }
 0x401   :  { %2901 = vmatpush1.bf16.msra.mxu1 %v3575_v46  ;;  %2820 = vmatprep.subr.bf16.mxu0 %v3582_v47  ;;  %v3638_v46 = vcombine.high %v1313_v40, %v1317_v41  ;;  %v3640_v47 = vcombine.high %v1314_v42, %v1318_v43 }
 0x402   :  { %2902 = vmatprep.subr.bf16.mxu1 %v3584_v51  ;;  %v3637_v51 = vcombine.low %v1313_v40, %v1317_v41 }
 0x404   :  { %2821 = vmatpush1.bf16.msra.mxu0 %v3581_v59 }
 0x405   :  { %2903 = vmatpush1.bf16.msra.mxu1 %v3583_v60  ;;  %2822 = vmatprep.subr.bf16.mxu0 %v3590_v61 }
 0x406   :  { %2904 = vmatprep.subr.bf16.mxu1 %v3592_v62 }
 0x408   :  { %2823 = vmatpush1.bf16.msra.mxu0 %v3589_v32 }
 0x409   :  { %2905 = vmatpush1.bf16.msra.mxu1 %v3591_v33  ;;  %2824 = vmatprep.subr.bf16.mxu0 %v3598_v2 }
 0x40a   :  { %2906 = vmatprep.subr.bf16.mxu1 %v3600_v3 }
 0x40c   :  { %2825 = vmatpush1.bf16.msra.mxu0 %v3597_v8 }
 0x40d   :  { %2907 = vmatpush1.bf16.msra.mxu1 %v3599_v9  ;;  %2826 = vmatprep.subr.bf16.mxu0 %v3606_v10 }
 0x40e   :  { %2908 = vmatprep.subr.bf16.mxu1 %v3608_v11 }
 0x410   :  { %2827 = vmatpush1.bf16.msra.mxu0 %v3605_v18 }
 0x411   :  { %2909 = vmatpush1.bf16.msra.mxu1 %v3607_v19  ;;  %2828 = vmatprep.subr.bf16.mxu0 %v3614_v48 }
 0x412   :  { %2910 = vmatprep.subr.bf16.mxu1 %v3616_v49 }
 0x414   :  { %2829 = vmatpush1.bf16.msra.mxu0 %v3613_v20 }
 0x415   :  { %2911 = vmatpush1.bf16.msra.mxu1 %v3615_v24  ;;  %2830 = vmatprep.subr.bf16.mxu0 %v3622_v25 }
 0x416   :  { %2912 = vmatprep.subr.bf16.mxu1 %v3624_v26 }
 0x418   :  { %2831 = vmatpush1.bf16.msra.mxu0 %v3621_v36 }
 0x419   :  { %2913 = vmatpush1.bf16.msra.mxu1 %v3623_v37  ;;  %2832 = vmatprep.subr.bf16.mxu0 %v3630_v38 }
 0x41a   :  { %2914 = vmatprep.subr.bf16.mxu1 %v3632_v39 }
 0x41c   :  { %2833 = vmatpush1.bf16.msra.mxu0 %v3629_v44 }
 0x41d   :  { %2915 = vmatpush1.bf16.msra.mxu1 %v3631_v45  ;;  %2834 = vmatprep.subr.bf16.mxu0 %v3638_v46 }
 0x41e   :  { %2916 = vmatprep.subr.bf16.mxu1 %v3640_v47 }
 0x420   :  { %2835 = vmatpush1.bf16.msra.mxu0 %v3637_v51 }
 0x421   :  { %2917 = vmatpush1.bf16.msra.mxu1 %v3639_v55 }
 0x423   :  { %2837 = vmatmul.mubr.bf16.vlgmr.msra.gmra.mrb[12].mxu0 %v4182_v21 }
 0x424   :  { %2919 = vmatmul.mubr.bf16.vlgmr.msra.gmra.mrb[12].mxu1 %v4182_v21 }
 0x476   :  { %v2674_v1 = vpop.f32.mrb[8].mxu0  ;;  %v2756_v56 = vpop.f32.mrb[8].mxu1 }
 0x477   :  { %v2929_v57 = vrot.slane %v2674_v1, 4  ;;  %v2941_v59 = vrot.slane %v2756_v56, 4  ;;  %v2676_v60 = vpop.f32.mrb[9].mxu0  ;;  %v2758_v61 = vpop.f32.mrb[9].mxu1 }
 0x478   :  { %v2935_v62 = vrot.slane %v2676_v60, 4  ;;  %v2947_v63 = vrot.slane %v2758_v61, 4  ;;  %v2678_v35 = vpop.f32.mrb[10].mxu0  ;;  %v2760_v0 = vpop.f32.mrb[10].mxu1 }
 0x479   :  { %v2930_v34 = vadd.f32 %v2929_v57, %v2674_v1  ;;  %v2942_v32 = vadd.f32 %v2941_v59, %v2756_v56  ;;  %v2679_v33 = vpop.f32.mrb[11].mxu0  ;;  %v2761_v2 = vpop.f32.mrb[11].mxu1 }
 0x47a   :  { %v2936_v3 = vadd.f32 %v2935_v62, %v2676_v60  ;;  %v2948_v4 = vadd.f32 %v2947_v63, %v2758_v61 }
 0x47b   :  { %v2931_v5 = vrot.slane %v2930_v34, 2  ;;  %v2943_v6 = vrot.slane %v2942_v32, 2 }
 0x47c   :  { %v2937_v7 = vrot.slane %v2936_v3, 2  ;;  %v2949_v21 = vrot.slane %v2948_v4, 2 }
 0x47d   :  { %v2932_v8 = vadd.f32 %v2931_v5, %v2930_v34  ;;  %v2944_v9 = vadd.f32 %v2943_v6, %v2942_v32 }
 0x47e   :  { %v2938_v10 = vadd.f32 %v2937_v7, %v2936_v3  ;;  %v2950_v11 = vadd.f32 %v2949_v21, %v2948_v4 }
 0x47f   :  { %v2933_v12 = vrot.slane %v2932_v8, 1  ;;  %v2945_v13 = vrot.slane %v2944_v9, 1 }
 0x480   :  { %v2939_v15 = vrot.slane %v2938_v10, 1  ;;  %v2951_v17 = vrot.slane %v2950_v11, 1 }
 0x481   :  { %v2934_v18 = vadd.f32 %v2933_v12, %v2932_v8  ;;  %v2946_v19 = vadd.f32 %v2945_v13, %v2944_v9 }
 0x482   :  { %v2940_v48 = vadd.f32 %v2939_v15, %v2938_v10  ;;  %v2952_v49 = vadd.f32 %v2951_v17, %v2950_v11 }
 0x483   :  { %v2977_v50 = vmul.f32 0.125, %v2934_v18  ;;  %v2979_v52 = vmul.f32 0.125, %v2946_v19 }
 0x484   :  { %v2978_v53 = vmul.f32 0.125, %v2940_v48  ;;  %v2980_v54 = vmul.f32 0.125, %v2952_v49 }
 0x485   :  { %v4194_v20 = vsub.f32 %v2674_v1, %v2977_v50  ;;  %v4196_v24 = vsub.f32 %v2756_v56, %v2979_v52 }
 0x486   :  { %v4198_v25 = vsub.f32 %v2676_v60, %v2978_v53  ;;  %v4200_v26 = vsub.f32 %v2758_v61, %v2980_v54 }
 0x487   :  { %v2993_v27 = vmul.f32 %v4194_v20, %v4194_v20  ;;  %v2995_v28 = vmul.f32 %v4196_v24, %v4196_v24 }
 0x488   :  { %v2994_v58 = vmul.f32 %v4198_v25, %v4198_v25  ;;  %v2996_v29 = vmul.f32 %v4200_v26, %v4200_v26 }
 0x489   :  { %v3001_v36 = vrot.slane %v2993_v27, 4  ;;  %v3013_v37 = vrot.slane %v2995_v28, 4 }
 0x48a   :  { %v3007_v38 = vrot.slane %v2994_v58, 4  ;;  %v3019_v39 = vrot.slane %v2996_v29, 4 }
 0x48b   :  { %v3002_v40 = vadd.f32 %v3001_v36, %v2993_v27  ;;  %v3014_v41 = vadd.f32 %v3013_v37, %v2995_v28 }
 0x48c   :  { %v3008_v42 = vadd.f32 %v3007_v38, %v2994_v58  ;;  %v3020_v43 = vadd.f32 %v3019_v39, %v2996_v29 }
 0x48d   :  { %v3003_v44 = vrot.slane %v3002_v40, 2  ;;  %v3015_v45 = vrot.slane %v3014_v41, 2 }
 0x48e   :  { %v3009_v46 = vrot.slane %v3008_v42, 2  ;;  %v3021_v47 = vrot.slane %v3020_v43, 2 }
 0x48f   :  { %v3004_v51 = vadd.f32 %v3003_v44, %v3002_v40  ;;  %v3016_v55 = vadd.f32 %v3015_v45, %v3014_v41 }
 0x490   :  { %v3010_v1 = vadd.f32 %v3009_v46, %v3008_v42  ;;  %v3022_v56 = vadd.f32 %v3021_v47, %v3020_v43 }
 0x491   :  { %v3005_v57 = vrot.slane %v3004_v51, 1  ;;  %v3017_v59 = vrot.slane %v3016_v55, 1 }
 0x492   :  { %v3011_v60 = vrot.slane %v3010_v1, 1  ;;  %v3023_v61 = vrot.slane %v3022_v56, 1 }
 0x493   :  { %v3006_v62 = vadd.f32 %v3005_v57, %v3004_v51  ;;  %v3018_v63 = vadd.f32 %v3017_v59, %v3016_v55 }
 0x494   :  { %v3012_v35 = vadd.f32 %v3011_v60, %v3010_v1  ;;  %v3024_v0 = vadd.f32 %v3023_v61, %v3022_v56 }
 0x495   :  { %v3049_v34 = vmul.f32 0.125, %v3006_v62  ;;  %v3051_v32 = vmul.f32 0.125, %v3018_v63 }
 0x496   :  { %v3050_v33 = vmul.f32 0.125, %v3012_v35  ;;  %v3052_v2 = vmul.f32 0.125, %v3024_v0 }
 0x497   :  { %v3057_v3 = vadd.f32 1e-05, %v3049_v34  ;;  %v3059_v4 = vadd.f32 1e-05, %v3051_v32 }
 0x498   :  { %v3058_v5 = vadd.f32 1e-05, %v3050_v33  ;;  %v3060_v6 = vadd.f32 1e-05, %v3052_v2 }
 0x499   :  { %3847 = vrsqrt.f32 %v3057_v3 }
 0x49a   :  { %3849 = vrsqrt.f32 %v3059_v4 }
 0x49b   :  { %3851 = vrsqrt.f32 %v3058_v5 }
 0x49c   :  { %3853 = vrsqrt.f32 %v3060_v6 }
 0x4a3   :  { %v3848_v7 = vpop.eup %3847 }
 0x4a4   :  { %v3850_v21 = vpop.eup %3849 }
 0x4a5   :  { %v3852_v8 = vpop.eup %3851 }
 0x4a6   :  { %v3854_v9 = vpop.eup %3853  ;;  %v3081_v10 = vcombine.low %v3848_v7, %v3852_v8 }
 0x4a7   :  { %v3082_v11 = vcombine.low %v3850_v21, %v3854_v9 }
 0x4a8   :  { %v4211_v12 = vrot.slane %v3081_v10, %v4080_v16 }
 0x4a9   :  { %v4214_v13 = vrot.slane %v3082_v11, %v4080_v16 }
 0x4ab   :  { %v3113_v15 = vcombine.low %v4211_v12, %v4214_v13 }
 0x4f6   :  { %v2838_v17 = vpop.f32.mrb[12].mxu0 }
 0x4f7   :  { %v2953_v18 = vrot.slane %v2838_v17, 4  ;;  %v2920_v19 = vpop.f32.mrb[12].mxu1  ;;  %v2840_v48 = vpop.f32.mrb[13].mxu0 }
 0x4f8   :  { %v2965_v49 = vrot.slane %v2920_v19, 4  ;;  %v2959_v50 = vrot.slane %v2840_v48, 4  ;;  %v2922_v52 = vpop.f32.mrb[13].mxu1  ;;  %v2842_v53 = vpop.f32.mrb[14].mxu0 }
 0x4f9   :  { %v2954_v54 = vadd.f32 %v2953_v18, %v2838_v17  ;;  %v2971_v27 = vrot.slane %v2922_v52, 4  ;;  %v2924_v28 = vpop.f32.mrb[14].mxu1  ;;  %v2843_v58 = vpop.f32.mrb[15].mxu0 }
 0x4fa   :  { %v2966_v29 = vadd.f32 %v2965_v49, %v2920_v19  ;;  %v2960_v36 = vadd.f32 %v2959_v50, %v2840_v48  ;;  %v2925_v37 = vpop.f32.mrb[15].mxu1 }
 0x4fb   :  { %v2955_v38 = vrot.slane %v2954_v54, 2  ;;  %v2972_v39 = vadd.f32 %v2971_v27, %v2922_v52 }
 0x4fc   :  { %v2967_v40 = vrot.slane %v2966_v29, 2  ;;  %v2961_v41 = vrot.slane %v2960_v36, 2 }
 0x4fd   :  { %v2956_v42 = vadd.f32 %v2955_v38, %v2954_v54  ;;  %v2973_v43 = vrot.slane %v2972_v39, 2 }
 0x4fe   :  { %v2968_v44 = vadd.f32 %v2967_v40, %v2966_v29  ;;  %v2962_v45 = vadd.f32 %v2961_v41, %v2960_v36 }
 0x4ff   :  { %v2957_v46 = vrot.slane %v2956_v42, 1  ;;  %v2974_v47 = vadd.f32 %v2973_v43, %v2972_v39 }
 0x500   :  { %v2969_v51 = vrot.slane %v2968_v44, 1  ;;  %v2963_v55 = vrot.slane %v2962_v45, 1 }
 0x501   :  { %v2958_v1 = vadd.f32 %v2957_v46, %v2956_v42  ;;  %v2975_v56 = vrot.slane %v2974_v47, 1 }
 0x502   :  { %v2970_v57 = vadd.f32 %v2969_v51, %v2968_v44  ;;  %v2964_v59 = vadd.f32 %v2963_v55, %v2962_v45 }
 0x503   :  { %v2981_v60 = vmul.f32 0.125, %v2958_v1  ;;  %v2976_v61 = vadd.f32 %v2975_v56, %v2974_v47 }
 0x504   :  { %v2983_v62 = vmul.f32 0.125, %v2970_v57  ;;  %v2982_v63 = vmul.f32 0.125, %v2964_v59 }
 0x505   :  { %v4218_v35 = vsub.f32 %v2838_v17, %v2981_v60  ;;  %v2984_v0 = vmul.f32 0.125, %v2976_v61 }
 0x506   :  { %v4220_v34 = vsub.f32 %v2920_v19, %v2983_v62  ;;  %v4222_v32 = vsub.f32 %v2840_v48, %v2982_v63  ;;  %v2928_v63 = vld [vmem:[%s4298_s11] sm:$0xff] }
 0x507   :  { %v2997_v33 = vmul.f32 %v4218_v35, %v4218_v35  ;;  %v4226_v2 = vsub.f32 %v2922_v52, %v2984_v0  ;;  %v3121_v0 = vrot.slane %v3113_v15, %v4080_v16  ;;  %v3189_v12 = vrot.slane %v2928_v63, %v4091_v23 }
 0x508   :  { %v2999_v3 = vmul.f32 %v4220_v34, %v4220_v34  ;;  %v2998_v4 = vmul.f32 %v4222_v32, %v4222_v32  ;;  %v3197_v13 = vrot.slane %v2928_v63, %v4142_v30 }
 0x509   :  { %v3025_v5 = vrot.slane %v2997_v33, 4  ;;  %v3000_v6 = vmul.f32 %v4226_v2, %v4226_v2 }
 0x50a   :  { %v3037_v7 = vrot.slane %v2999_v3, 4  ;;  %v3031_v21 = vrot.slane %v2998_v4, 4 }
 0x50b   :  { %v3026_v8 = vadd.f32 %v3025_v5, %v2997_v33  ;;  %v3043_v9 = vrot.slane %v3000_v6, 4 }
 0x50c   :  { %v3038_v10 = vadd.f32 %v3037_v7, %v2999_v3  ;;  %v3032_v11 = vadd.f32 %v3031_v21, %v2998_v4  ;;  %v2927_v3 = vld [vmem:[%s4297_s10] sm:$0xff]  ;;  %v3151_v4 = vsub.s32 4, %v4077_v14  ;;  %v3185_v7 = vrot.slane %v2928_v63, %v4088_v22 }
 0x50d   :  { %v3027_v17 = vrot.slane %v3026_v8, 2  ;;  %v3044_v18 = vadd.f32 %v3043_v9, %v3000_v6  ;;  %v3155_v6 = vsub.s32 5, %v4077_v14  ;;  %v3159_v21 = vsub.s32 6, %v4077_v14 }
 0x50e   :  { %v3039_v19 = vrot.slane %v3038_v10, 2  ;;  %v3033_v48 = vrot.slane %v3032_v11, 2 }
 0x50f   :  { %v3028_v49 = vadd.f32 %v3027_v17, %v3026_v8  ;;  %v3045_v50 = vrot.slane %v3044_v18, 2  ;;  %v3163_v8 = vsub.s32 7, %v4077_v14  ;;  %v3205_v9 = vrot.slane %v2928_v63, %v3155_v6 }
 0x510   :  { %v3040_v52 = vadd.f32 %v3039_v19, %v3038_v10  ;;  %v3034_v53 = vadd.f32 %v3033_v48, %v3032_v11  ;;  %v3193_v10 = vrot.slane %v2928_v63, %v4145_v31  ;;  %v3209_v11 = vrot.slane %v2928_v63, %v3159_v21 }
 0x511   :  { %v3029_v54 = vrot.slane %v3028_v49, 1  ;;  %v3046_v27 = vadd.f32 %v3045_v50, %v3044_v18  ;;  %v3213_v17 = vrot.slane %v2928_v63, %v3163_v8 }
 0x512   :  { %v3041_v28 = vrot.slane %v3040_v52, 1  ;;  %v3035_v58 = vrot.slane %v3034_v53, 1 }
 0x513   :  { %v3030_v29 = vadd.f32 %v3029_v54, %v3028_v49  ;;  %v3047_v36 = vrot.slane %v3046_v27, 1 }
 0x514   :  { %v3042_v37 = vadd.f32 %v3041_v28, %v3040_v52  ;;  %v3036_v38 = vadd.f32 %v3035_v58, %v3034_v53 }
 0x515   :  { %v3053_v39 = vmul.f32 0.125, %v3030_v29  ;;  %v3048_v40 = vadd.f32 %v3047_v36, %v3046_v27 }
 0x516   :  { %v3055_v41 = vmul.f32 0.125, %v3042_v37  ;;  %v3054_v42 = vmul.f32 0.125, %v3036_v38 }
 0x517   :  { %v3061_v43 = vadd.f32 1e-05, %v3053_v39  ;;  %v3056_v44 = vmul.f32 0.125, %v3048_v40 }
 0x518   :  { %v3063_v45 = vadd.f32 1e-05, %v3055_v41  ;;  %v3062_v46 = vadd.f32 1e-05, %v3054_v42 }
 0x519   :  { %3855 = vrsqrt.f32 %v3061_v43  ;;  %v3064_v47 = vadd.f32 1e-05, %v3056_v44 }
 0x51a   :  { %3857 = vrsqrt.f32 %v3063_v45 }
 0x51b   :  { %3859 = vrsqrt.f32 %v3062_v46 }
 0x51c   :  { %3861 = vrsqrt.f32 %v3064_v47 }
 0x523   :  { %v3856_v51 = vpop.eup %3855 }
 0x524   :  { %v3858_v55 = vpop.eup %3857 }
 0x525   :  { %v3860_v1 = vpop.eup %3859 }
 0x526   :  { %v3862_v56 = vpop.eup %3861  ;;  %v3083_v57 = vcombine.low %v3856_v51, %v3860_v1 }
 0x527   :  { %v3084_v59 = vcombine.low %v3858_v55, %v3862_v56 }
 0x528   :  { %v3105_v60 = vrot.slane %v3083_v57, %v4080_v16 }
 0x529   :  { %v3112_v61 = vrot.slane %v3084_v59, %v4080_v16 }
 0x52b   :  { %v3114_v62 = vcombine.low %v3105_v60, %v3112_v61 }
 0x52d   :  { %v3128_v33 = vrot.slane %v3114_v62, %v4080_v16  ;;  %v3201_v16 = vrot.slane %v2928_v63, %v3151_v4 }
 0x52f   :  { %v3129_v5 = vcombine.low %v3121_v0, %v3128_v33 }
 0x531   :  { %v3131_v15 = vmul.f32 %v3129_v5, %v2927_v3 }
 0x533   :  { %v3136_v18 = vrot.slane %v3131_v15, %v4088_v22  ;;  %v3140_v19 = vrot.slane %v3131_v15, %v4091_v23  ;;  %v3144_v48 = vrot.slane %v3131_v15, %v4145_v31  ;;  %v3148_v49 = vrot.slane %v3131_v15, %v4142_v30 }
 0x534   :  { %v3152_v14 = vrot.slane %v3131_v15, %v3151_v4  ;;  %v3156_v50 = vrot.slane %v3131_v15, %v3155_v6  ;;  %v3160_v52 = vrot.slane %v3131_v15, %v3159_v21  ;;  %v3164_v53 = vrot.slane %v3131_v15, %v3163_v8 }
 0x535   :  { %v3173_v54 = vmul.f32 %v3136_v18, %v4194_v20  ;;  %v3174_v27 = vmul.f32 %v3140_v19, %v4198_v25  ;;  %v3175_v28 = vmul.f32 %v3144_v48, %v4196_v24  ;;  %v3176_v58 = vmul.f32 %v3148_v49, %v4200_v26 }
 0x536   :  { %v3177_v22 = vmul.f32 %v3152_v14, %v4218_v35  ;;  %v3178_v23 = vmul.f32 %v3156_v50, %v4222_v32  ;;  %v3179_v31 = vmul.f32 %v3160_v52, %v4220_v34  ;;  %v3180_v30 = vmul.f32 %v3164_v53, %v4226_v2 }
 0x537   :  { %v3222_v29 = vadd.f32 %v3185_v7, %v3173_v54  ;;  %v3223_v36 = vadd.f32 %v3189_v12, %v3174_v27  ;;  %v3224_v37 = vadd.f32 %v3193_v10, %v3175_v28  ;;  %v3225_v38 = vadd.f32 %v3197_v13, %v3176_v58 }
 0x538   :  { %v3226_v39 = vadd.f32 %v3201_v16, %v3177_v22  ;;  %v3227_v20 = vadd.f32 %v3205_v9, %v3178_v23  ;;  %v3228_v40 = vadd.f32 %v3209_v11, %v3179_v31  ;;  %v3229_v25 = vadd.f32 %v3213_v17, %v3180_v30 }
 0x539   :  { %vm3230_vm8 = vcmp.gt.f32.partialorder %v3222_v29, 0.0  ;;  %vm3231_vm9 = vcmp.gt.f32.partialorder %v3223_v36, 0.0  ;;  %vm3232_vm10 = vcmp.gt.f32.partialorder %v3224_v37, 0.0  ;;  %vm3233_vm11 = vcmp.gt.f32.partialorder %v3225_v38, 0.0 }
 0x53a   :  { %vm3234_vm12 = vcmp.gt.f32.partialorder %v3226_v39, 0.0  ;;  %vm3235_vm13 = vcmp.gt.f32.partialorder %v3227_v20, 0.0  ;;  %vm3236_vm14 = vcmp.gt.f32.partialorder %v3228_v40, 0.0  ;;  %vm3237_vm15 = vcmp.gt.f32.partialorder %v3229_v25, 0.0 }
 0x53b   :  { %v3238_v24 = vmul.f32 0.2, %v3222_v29  ;;  %v3239_v26 = vmul.f32 0.2, %v3223_v36  ;;  %v3240_v35 = vmul.f32 0.2, %v3224_v37 }
 0x53c   :  { %v3241_v34 = vmul.f32 0.2, %v3225_v38  ;;  %v3242_v32 = vmul.f32 0.2, %v3226_v39  ;;  %v3243_v2 = vmul.f32 0.2, %v3227_v20 }
 0x53d   :  { %v3244_v41 = vmul.f32 0.2, %v3228_v40  ;;  %v3245_v42 = vmul.f32 0.2, %v3229_v25  ;;  %v3246_v43 = vsel %vm3230_vm8, %v3222_v29, %v3238_v24  ;;  %v3247_v44 = vsel %vm3231_vm9, %v3223_v36, %v3239_v26 }
 0x53e   :  { %v3248_v45 = vsel %vm3232_vm10, %v3224_v37, %v3240_v35  ;;  %v3249_v46 = vsel %vm3233_vm11, %v3225_v38, %v3241_v34  ;;  %v3250_v47 = vsel %vm3234_vm12, %v3226_v39, %v3242_v32  ;;  %v3251_v51 = vsel %vm3235_vm13, %v3227_v20, %v3243_v2 }
 0x53f   :  { %v3252_v55 = vsel %vm3236_vm14, %v3228_v40, %v3244_v41  ;;  %v3253_v1 = vsel %vm3237_vm15, %v3229_v25, %v3245_v42  ;;  %v3645_v56 = vpack.c.bf16 %v3247_v44, %v3246_v43  ;;  %v3646_v57 = vpack.c.bf16 %v3249_v46, %v3248_v45 }
 0x540   :  { %v3647_v59 = vpack.c.bf16 %v3251_v51, %v3250_v47  ;;  %v3648_v60 = vpack.c.bf16 %v3253_v1, %v3252_v55 }
 0x541   :  { %3286 = vst [vmem:[%s4299_s12] sm:$0xff] %v3645_v56  ;;  %3287 = vst [vmem:[%s4299_s12 + $0x8] sm:$0xff] %v3646_v57 }
 0x542   :  { %3288 = vst [vmem:[%s4299_s12 + $0x10] sm:$0xff] %v3647_v59  ;;  %3289 = vst [vmem:[%s4299_s12 + $0x18] sm:$0xff] %v3648_v60 }
 0x543   :  { %3294 = vsyncpa [#allocation3], 1 }
 0x544   :  { %3295 = vsyncpa [#allocation5], 1 }

</bundles_post_ra>
